<compile_context>
chip_gen: v5e
topology: v5e:2x2
jax: 0.10.0
libtpu: 0.0.40
codegen_flags: <defaults>
</compile_context>

<pallas_src>
from typing import Any, Dict, List, Sequence, Tuple

import jax
import jax.numpy as jnp
import numpy as np
from jax.experimental import pallas as pl
from jax.experimental.pallas import tpu as pltpu


def _round_up(x: int, m: int) -> int:
    return (x + m - 1) // m * m


# ---------------------------------------------------------------------------
# Kernel
# ---------------------------------------------------------------------------
def _make_mlp_kernel(layer_cfg: List[Dict[str, Any]]):
    """Builds a Pallas kernel that runs the whole MLP on one batch tile.

    Per-layer parameter refs arrive flattened, in order:
      block:  W_folded (in,out) bf16, shift (1,out) f32, [W_proj (in,out) bf16 if proj]
      final:  W_padded (in,out_pad) bf16
    """

    def kernel(x_ref, *refs):
        out_ref = refs[-1]
        params = refs[:-1]
        h = x_ref[...].astype(jnp.float32)
        idx = 0
        for cfg in layer_cfg:
            if cfg["kind"] == "block":
                w = params[idx][...]          # BN scale pre-folded into columns (bf16)
                shift = params[idx + 1][...]  # BN shift (f32)
                idx += 2
                hb = h.astype(w.dtype)        # bf16 MXU operands, f32 accumulation
                z = jnp.dot(hb, w, preferred_element_type=jnp.float32)
                z = z + shift
                # tanh-approx GELU lowers to the EUP slot (free w.r.t. the VALU).
                z = jax.nn.gelu(z, approximate=True)
                # Dropout: identity in eval mode.
                if cfg["proj"]:
                    wp = params[idx][...]
                    idx += 1
                    res = jnp.dot(hb, wp, preferred_element_type=jnp.float32)
                else:
                    res = h
                h = z + res
            else:  # final plain Linear (output columns zero-padded to 128 lanes)
                w = params[idx][...]
                idx += 1
                h = jnp.dot(h.astype(w.dtype), w, preferred_element_type=jnp.float32)
        out_ref[...] = h.astype(out_ref.dtype)

    return kernel


# ---------------------------------------------------------------------------
# Parameter construction (kernel params + unfolded f32 reference params)
# ---------------------------------------------------------------------------
def init_mlp_encoder_params(
    key,
    *,
    input_dim: int,
    output_dim: int,
    hidden_dims: Sequence[int],
    batchnorm: bool = True,
    skip_connections: bool = True,
    eps: float = 1e-5,
    matmul_dtype=jnp.bfloat16,
    lane_pad: int = 128,
) -> Tuple[List[Dict[str, Any]], List[jnp.ndarray], List[jnp.ndarray]]:
    """Returns (layer_cfg, kernel_params, ref_params).

    kernel_params: BN-scale-folded bf16 weights, f32 shifts, lane-padded final W.
    ref_params:    original f32 (W, scale, shift, [W_proj]) / final W — used only
                   by the pure-JAX reference.
    """
    dims = [input_dim] + list(hidden_dims) + [output_dim]
    layer_cfg: List[Dict[str, Any]] = []
    kernel_params: List[jnp.ndarray] = []
    ref_params: List[jnp.ndarray] = []
    out_pad = _round_up(output_dim, lane_pad)

    for i in range(len(dims) - 1):
        in_d, out_d = dims[i], dims[i + 1]
        key, kw, kp = jax.random.split(key, 3)
        w = jax.random.normal(kw, (in_d, out_d), jnp.float32) * 0.05
        if i == len(dims) - 2:
            layer_cfg.append({"kind": "final"})
            # Zero-pad output columns to a lane-dense multiple of 128.
            w_pad = jnp.zeros((in_d, out_pad), jnp.float32).at[:, :out_d].set(w)
            kernel_params.append(w_pad.astype(matmul_dtype))
            ref_params.append(w)
            break
        # BatchNorm1d eval-mode: scale = gamma/sqrt(var+eps), shift = beta - mean*scale
        if batchnorm:
            gamma = jnp.ones((out_d,), jnp.float32)
            beta = jnp.zeros((out_d,), jnp.float32)
            r_mean = jnp.zeros((out_d,), jnp.float32)
            r_var = jnp.ones((out_d,), jnp.float32)
            scale = gamma / jnp.sqrt(r_var + eps)
            shift = beta - r_mean * scale
        else:
            scale = jnp.ones((out_d,), jnp.float32)
            shift = jnp.zeros((out_d,), jnp.float32)
        need_proj = skip_connections and (in_d != out_d)
        layer_cfg.append({"kind": "block", "proj": need_proj})
        # Fold BN scale into the weight columns: (h @ W) * scale == h @ (W * scale).
        w_folded = (w * scale[None, :]).astype(matmul_dtype)
        kernel_params.extend([w_folded, shift.reshape(1, out_d).astype(jnp.float32)])
        ref_params.extend([w, scale, shift])
        if need_proj:
            wp = jax.random.normal(kp, (in_d, out_d), jnp.float32) * 0.05
            kernel_params.append(wp.astype(matmul_dtype))
            ref_params.append(wp)
    return layer_cfg, kernel_params, ref_params


# ---------------------------------------------------------------------------
# Wrapper (pallas_call plumbing)
# ---------------------------------------------------------------------------
def mlp_encoder_forward(
    x: jnp.ndarray,
    layer_cfg: List[Dict[str, Any]],
    kernel_params: List[jnp.ndarray],
    *,
    output_dim: int,
    batch_tile: int = 256,
) -> jnp.ndarray:
    """Applies the MLP encoder. Handles >2D inputs like the PyTorch module."""
    x = x.astype(jnp.float32)
    orig_shape = x.shape
    if x.ndim > 2:
        x = x.reshape(-1, orig_shape[-1])
    B, D_in = x.shape
    out_pad = kernel_params[-1].shape[-1]  # lane-dense padded output width

    # Pad the batch up to a multiple of the MXU-friendly tile; slice after.
    B_pad = _round_up(max(B, 1), batch_tile)
    if B_pad != B:
        x = jnp.pad(x, ((0, B_pad - B), (0, 0)))

    kernel = _make_mlp_kernel(layer_cfg)

    # x tiled over batch; parameters replicated (same block each grid step,
    # resident in VMEM).
    in_specs = [pl.BlockSpec((batch_tile, D_in), lambda i: (i, 0))]
    for p in kernel_params:
        # TODO(synk): on v7x with very wide hidden dims, pass
        #             pipeline_mode=pl.Buffered(1) here to drop the redundant
        #             double-buffer of each replicated (index-invariant) parameter.
        in_specs.append(pl.BlockSpec(p.shape, lambda i: (0, 0)))

    out_spec = pl.BlockSpec((batch_tile, out_pad), lambda i: (i, 0))

    out = pl.pallas_call(
        kernel,
        out_shape=jax.ShapeDtypeStruct((B_pad, out_pad), jnp.float32),
        grid_spec=pltpu.PrefetchScalarGridSpec(
            num_scalar_prefetch=0,
            grid=(B_pad // batch_tile,),
            in_specs=in_specs,
            out_specs=out_spec,
        ),
        compiler_params=pltpu.CompilerParams(
            dimension_semantics=("parallel",),
            vmem_limit_bytes=64 * 1024 * 1024,
        ),
    )(x, *kernel_params)

    out = out[:B, :output_dim]
    if len(orig_shape) > 2:
        out = out.reshape(*orig_shape[:-1], output_dim)
    return out


# ---------------------------------------------------------------------------
# Pure-JAX reference (f32, exact-erf GELU — matches the PyTorch module spec)
# ---------------------------------------------------------------------------
def _reference_forward(x, layer_cfg, ref_params, *, output_dim):
    orig_shape = x.shape
    h = x.astype(jnp.float32)
    if h.ndim > 2:
        h = h.reshape(-1, orig_shape[-1])
    idx = 0
    for cfg in layer_cfg:
        if cfg["kind"] == "block":
            w, scale, shift = ref_params[idx], ref_params[idx + 1], ref_params[idx + 2]
            idx += 3
            z = h @ w
            z = z * scale + shift
            z = jax.nn.gelu(z, approximate=False)
            if cfg["proj"]:
                res = h @ ref_params[idx]
                idx += 1
            else:
                res = h
            h = z + res
        else:
            h = h @ ref_params[idx]
            idx += 1
    if len(orig_shape) > 2:
        h = h.reshape(*orig_shape[:-1], output_dim)
    return h


# ---------------------------------------------------------------------------
# Main
# ---------------------------------------------------------------------------
if __name__ == "__main__":
    key = jax.random.PRNGKey(0)
    kx, kp = jax.random.split(key)

    # Small config consistent with the module:
    #   input_dim=64, hidden_dims=[128, 128], output_dim=32
    #   -> block0 has a residual projection (64 != 128), block1 is identity-residual.
    input_dim, output_dim = 64, 32
    hidden_dims = [128, 128]

    layer_cfg, kernel_params, ref_params = init_mlp_encoder_params(
        kp,
        input_dim=input_dim,
        output_dim=output_dim,
        hidden_dims=hidden_dims,
        batchnorm=True,
        skip_connections=True,
    )

    # >2D input exercises the reshape path of the PyTorch forward();
    # the flattened batch (16) also exercises the pad-to-tile path.
    x = jax.random.normal(kx, (2, 8, input_dim), jnp.float32)

    y = mlp_encoder_forward(
        x, layer_cfg, kernel_params, output_dim=output_dim, batch_tile=256
    )
    y = jax.block_until_ready(y)

    y_ref = _reference_forward(x, layer_cfg, ref_params, output_dim=output_dim)
    # bf16 MXU operands + tanh-GELU vs f32 exact reference -> loosened tolerance.
    np.testing.assert_allclose(np.asarray(y), np.asarray(y_ref), rtol=5e-2, atol=5e-2)
    assert y.shape == (2, 8, output_dim)

    print("KERNEL_OK")
</pallas_src>

<mosaic_0001>
module attributes {stable_mosaic.version = 11 : i64} {
  func.func @kernel(%arg0: i32, %arg1: memref<256x64xf32, #tpu.memory_space<vmem>>, %arg2: memref<64x128xbf16, #tpu.memory_space<vmem>>, %arg3: memref<1x128xf32, #tpu.memory_space<vmem>>, %arg4: memref<64x128xbf16, #tpu.memory_space<vmem>>, %arg5: memref<128x128xbf16, #tpu.memory_space<vmem>>, %arg6: memref<1x128xf32, #tpu.memory_space<vmem>>, %arg7: memref<128x128xbf16, #tpu.memory_space<vmem>>, %arg8: memref<256x128xf32, #tpu.memory_space<vmem>>) attributes {dimension_semantics = [#tpu.dimension_semantics<parallel>], iteration_bounds = array<i64: 1>, scalar_prefetch = 0 : i64, scratch_operands = 0 : i64, tpu.core_type = #tpu.core_type<tc>, window_params = [{transform_indices = @transform_0, window_bounds = array<i64: 256, 64>}, {pipeline_mode = #tpu.pipeline_mode<synchronous>, transform_indices = @transform_1, window_bounds = array<i64: 64, 128>}, {pipeline_mode = #tpu.pipeline_mode<synchronous>, transform_indices = @transform_2, window_bounds = array<i64: 1, 128>}, {pipeline_mode = #tpu.pipeline_mode<synchronous>, transform_indices = @transform_3, window_bounds = array<i64: 64, 128>}, {pipeline_mode = #tpu.pipeline_mode<synchronous>, transform_indices = @transform_4, window_bounds = array<i64: 128, 128>}, {pipeline_mode = #tpu.pipeline_mode<synchronous>, transform_indices = @transform_5, window_bounds = array<i64: 1, 128>}, {pipeline_mode = #tpu.pipeline_mode<synchronous>, transform_indices = @transform_6, window_bounds = array<i64: 128, 128>}, {transform_indices = @transform_7, window_bounds = array<i64: 256, 128>}]} {
    %c0 = arith.constant 0 : index
    %c0_0 = arith.constant 0 : index
    %0 = vector.load %arg1[%c0, %c0_0] : memref<256x64xf32, #tpu.memory_space<vmem>>, vector<256x64xf32>
    %c0_1 = arith.constant 0 : index
    %c0_2 = arith.constant 0 : index
    %1 = vector.load %arg2[%c0_1, %c0_2] : memref<64x128xbf16, #tpu.memory_space<vmem>>, vector<64x128xbf16>
    %c0_3 = arith.constant 0 : index
    %c0_4 = arith.constant 0 : index
    %2 = vector.load %arg3[%c0_3, %c0_4] : memref<1x128xf32, #tpu.memory_space<vmem>>, vector<1x128xf32>
    %3 = arith.truncf %0 : vector<256x64xf32> to vector<256x64xbf16>
    %cst = arith.constant dense<0.000000e+00> : vector<256x128xf32>
    %4 = tpu.matmul %3, %1, %cst {dimension_numbers = #tpu.dot_dimension_numbers<[1], [0], [0], [1], [0, 0, 1, 1], [], []>} : vector<256x64xbf16>, vector<64x128xbf16>, vector<256x128xf32> -> vector<256x128xf32>
    %5 = vector.broadcast %2 : vector<1x128xf32> to vector<256x128xf32>
    %6 = arith.addf %4, %5 : vector<256x128xf32>
    %7 = arith.mulf %6, %6 : vector<256x128xf32>
    %8 = arith.mulf %6, %7 : vector<256x128xf32>
    %cst_5 = arith.constant 4.471500e-02 : f32
    %9 = vector.broadcast %cst_5 : f32 to vector<256x128xf32>
    %10 = arith.mulf %9, %8 : vector<256x128xf32>
    %11 = arith.addf %6, %10 : vector<256x128xf32>
    %cst_6 = arith.constant 0.797884583 : f32
    %12 = vector.broadcast %cst_6 : f32 to vector<256x128xf32>
    %13 = arith.mulf %12, %11 : vector<256x128xf32>
    %14 = math.tanh %13 : vector<256x128xf32>
    %cst_7 = arith.constant 1.000000e+00 : f32
    %15 = vector.broadcast %cst_7 : f32 to vector<256x128xf32>
    %16 = arith.addf %15, %14 : vector<256x128xf32>
    %cst_8 = arith.constant 5.000000e-01 : f32
    %17 = vector.broadcast %cst_8 : f32 to vector<256x128xf32>
    %18 = arith.mulf %17, %16 : vector<256x128xf32>
    %19 = arith.mulf %6, %18 : vector<256x128xf32>
    %c0_9 = arith.constant 0 : index
    %c0_10 = arith.constant 0 : index
    %20 = vector.load %arg4[%c0_9, %c0_10] : memref<64x128xbf16, #tpu.memory_space<vmem>>, vector<64x128xbf16>
    %cst_11 = arith.constant dense<0.000000e+00> : vector<256x128xf32>
    %21 = tpu.matmul %3, %20, %cst_11 {dimension_numbers = #tpu.dot_dimension_numbers<[1], [0], [0], [1], [0, 0, 1, 1], [], []>} : vector<256x64xbf16>, vector<64x128xbf16>, vector<256x128xf32> -> vector<256x128xf32>
    %22 = arith.addf %19, %21 : vector<256x128xf32>
    %c0_12 = arith.constant 0 : index
    %c0_13 = arith.constant 0 : index
    %23 = vector.load %arg5[%c0_12, %c0_13] : memref<128x128xbf16, #tpu.memory_space<vmem>>, vector<128x128xbf16>
    %c0_14 = arith.constant 0 : index
    %c0_15 = arith.constant 0 : index
    %24 = vector.load %arg6[%c0_14, %c0_15] : memref<1x128xf32, #tpu.memory_space<vmem>>, vector<1x128xf32>
    %25 = arith.truncf %22 : vector<256x128xf32> to vector<256x128xbf16>
    %cst_16 = arith.constant dense<0.000000e+00> : vector<256x128xf32>
    %26 = tpu.matmul %25, %23, %cst_16 {dimension_numbers = #tpu.dot_dimension_numbers<[1], [0], [0], [1], [0, 0, 1, 1], [], []>} : vector<256x128xbf16>, vector<128x128xbf16>, vector<256x128xf32> -> vector<256x128xf32>
    %27 = vector.broadcast %24 : vector<1x128xf32> to vector<256x128xf32>
    %28 = arith.addf %26, %27 : vector<256x128xf32>
    %29 = arith.mulf %28, %28 : vector<256x128xf32>
    %30 = arith.mulf %28, %29 : vector<256x128xf32>
    %cst_17 = arith.constant 4.471500e-02 : f32
    %31 = vector.broadcast %cst_17 : f32 to vector<256x128xf32>
    %32 = arith.mulf %31, %30 : vector<256x128xf32>
    %33 = arith.addf %28, %32 : vector<256x128xf32>
    %cst_18 = arith.constant 0.797884583 : f32
    %34 = vector.broadcast %cst_18 : f32 to vector<256x128xf32>
    %35 = arith.mulf %34, %33 : vector<256x128xf32>
    %36 = math.tanh %35 : vector<256x128xf32>
    %cst_19 = arith.constant 1.000000e+00 : f32
    %37 = vector.broadcast %cst_19 : f32 to vector<256x128xf32>
    %38 = arith.addf %37, %36 : vector<256x128xf32>
    %cst_20 = arith.constant 5.000000e-01 : f32
    %39 = vector.broadcast %cst_20 : f32 to vector<256x128xf32>
    %40 = arith.mulf %39, %38 : vector<256x128xf32>
    %41 = arith.mulf %28, %40 : vector<256x128xf32>
    %42 = arith.addf %41, %22 : vector<256x128xf32>
    %c0_21 = arith.constant 0 : index
    %c0_22 = arith.constant 0 : index
    %43 = vector.load %arg7[%c0_21, %c0_22] : memref<128x128xbf16, #tpu.memory_space<vmem>>, vector<128x128xbf16>
    %44 = arith.truncf %42 : vector<256x128xf32> to vector<256x128xbf16>
    %cst_23 = arith.constant dense<0.000000e+00> : vector<256x128xf32>
    %45 = tpu.matmul %44, %43, %cst_23 {dimension_numbers = #tpu.dot_dimension_numbers<[1], [0], [0], [1], [0, 0, 1, 1], [], []>} : vector<256x128xbf16>, vector<128x128xbf16>, vector<256x128xf32> -> vector<256x128xf32>
    %c0_24 = arith.constant 0 : index
    %c0_25 = arith.constant 0 : index
    %46 = vector.load %arg8[%c0_24, %c0_25] : memref<256x128xf32, #tpu.memory_space<vmem>>, vector<256x128xf32>
    tpu.vector_store %arg8[%c0_24, %c0_25], %45 {strides = array<i32>} : memref<256x128xf32, #tpu.memory_space<vmem>>, vector<256x128xf32>,
    return
  }
  func.func @transform_0(%arg0: i32) -> (i32, i32) {
    %c0_i32 = arith.constant 0 : i32
    %c0_i32_0 = arith.constant 0 : i32
    return %arg0, %c0_i32 : i32, i32
  }
  func.func @transform_1(%arg0: i32) -> (i32, i32) {
    %c0_i32 = arith.constant 0 : i32
    %c0_i32_0 = arith.constant 0 : i32
    %c0_i32_1 = arith.constant 0 : i32
    return %c0_i32, %c0_i32_0 : i32, i32
  }
  func.func @transform_2(%arg0: i32) -> (i32, i32) {
    %c0_i32 = arith.constant 0 : i32
    %c0_i32_0 = arith.constant 0 : i32
    %c0_i32_1 = arith.constant 0 : i32
    return %c0_i32, %c0_i32_0 : i32, i32
  }
  func.func @transform_3(%arg0: i32) -> (i32, i32) {
    %c0_i32 = arith.constant 0 : i32
    %c0_i32_0 = arith.constant 0 : i32
    %c0_i32_1 = arith.constant 0 : i32
    return %c0_i32, %c0_i32_0 : i32, i32
  }
  func.func @transform_4(%arg0: i32) -> (i32, i32) {
    %c0_i32 = arith.constant 0 : i32
    %c0_i32_0 = arith.constant 0 : i32
    %c0_i32_1 = arith.constant 0 : i32
    return %c0_i32, %c0_i32_0 : i32, i32
  }
  func.func @transform_5(%arg0: i32) -> (i32, i32) {
    %c0_i32 = arith.constant 0 : i32
    %c0_i32_0 = arith.constant 0 : i32
    %c0_i32_1 = arith.constant 0 : i32
    return %c0_i32, %c0_i32_0 : i32, i32
  }
  func.func @transform_6(%arg0: i32) -> (i32, i32) {
    %c0_i32 = arith.constant 0 : i32
    %c0_i32_0 = arith.constant 0 : i32
    %c0_i32_1 = arith.constant 0 : i32
    return %c0_i32, %c0_i32_0 : i32, i32
  }
  func.func @transform_7(%arg0: i32) -> (i32, i32) {
    %c0_i32 = arith.constant 0 : i32
    %c0_i32_0 = arith.constant 0 : i32
    return %arg0, %c0_i32 : i32, i32
  }
}

</mosaic_0001>

<bundles_post_ra>
// kernel: tpu_custom_call.1
= control target key start
LH: loop header
LB: loop body
LE: loop exit
PB: predicated region body
PF: predicated region fallthrough
CT: control target
= control target key end

     0   :  { %s2413_s0 = inlined_call_operand.vmem [shape: f32[256,64], index: 0, kind: input, shape index: {}]   ;;  %s2414_s1 = inlined_call_operand.vmem [shape: bf16[64,128], index: 1, kind: input, shape index: {}]   ;;  %s2415_s2 = inlined_call_operand.vmem [shape: f32[1,128], index: 2, kind: input, shape index: {}]   ;;  %s2416_s3 = inlined_call_operand.vmem [shape: bf16[64,128], index: 3, kind: input, shape index: {}]   ;;  %s2417_s4 = inlined_call_operand.vmem [shape: bf16[128,128], index: 4, kind: input, shape index: {}]   ;;  %s2418_s5 = inlined_call_operand.vmem [shape: f32[1,128], index: 5, kind: input, shape index: {}]   ;;  %s2419_s6 = inlined_call_operand.vmem [shape: bf16[128,128], index: 6, kind: input, shape index: {}]   ;;  %s2420_s7 = inlined_call_operand.hbm [shape: f32[256,128], index: 7, kind: output, shape index: {}]  }
   0x1   :  { %v1534_v0 = vld [vmem:[%s2414_s1 + $0x18] sm:$0xff]  ;;  %v1533_v1 = vld [vmem:[%s2414_s1 + $0x10] sm:$0xff] }
   0x2   :  { %165 = vmatpush.bf16.msra.mxu0 %v1534_v0  ;;  %v1538_v2 = vld [vmem:[%s2416_s3 + $0x18] sm:$0xff]  ;;  %v1537_v3 = vld [vmem:[%s2416_s3 + $0x10] sm:$0xff] }
   0x3   :  { %574 = vmatpush.bf16.msra.mxu1 %v1538_v2 }
   0x4   :  { %12 = vsyncpa [#allocation3], 0  ;;  %v1532_v4 = vld [vmem:[%s2414_s1 + $0x8] sm:$0xff]  ;;  %v1531_v6 = vld [vmem:[%s2414_s1] sm:$0xff]  ;;  %vm112_vm0 = vcmask 523264   ;;  %s1391_s19 = sshll.u32 %s2420_s7, 4  ;;  %s1392_s19 = int_to_ptr.hbm [resolvable:$true] %s1391_s19 }
   0x5   :  { %v1536_v5 = vld [vmem:[%s2416_s3 + $0x8] sm:$0xff]  ;;  %v28_v7 = vld [vmem:[%s2413_s0] sm:$0xff]  ;;  %v30_v11 = vld [vmem:[%s2413_s0 + $0x10] sm:$0xff]  ;;  %s1717_s20 = smov 128   ;;  %s1718_s1 = smov 8  }
   0x6   :  { %166 = vmatpush.bf16.msra.mxu0 %v1533_v1  ;;  %v29_v8 = vld [vmem:[%s2413_s0 + $0x8] sm:$0xff]  ;;  %v1535_v9 = vld [vmem:[%s2416_s3] sm:$0xff]  ;;  %v31_v12 = vld [vmem:[%s2413_s0 + $0x18] sm:$0xff] }
   0x7   :  { %575 = vmatpush.bf16.msra.mxu1 %v1537_v3  ;;  %v69_v10 = vpack.c.bf16 %v29_v8, %v28_v7  ;;  %v70_v13 = vpack.c.bf16 %v31_v12, %v30_v11  ;;  %v32_v14 = vld [vmem:[%s2413_s0 + $0x20] sm:$0xff]  ;;  %v33_v15 = vld [vmem:[%s2413_s0 + $0x28] sm:$0xff]  ;;  %v34_v17 = vld [vmem:[%s2413_s0 + $0x30] sm:$0xff] }
   0x8   :  { %v71_v16 = vpack.c.bf16 %v33_v15, %v32_v14  ;;  %v35_v18 = vld [vmem:[%s2413_s0 + $0x38] sm:$0xff]  ;;  %v36_v20 = vld [vmem:[%s2413_s0 + $0x40] sm:$0xff]  ;;  %v37_v21 = vld [vmem:[%s2413_s0 + $0x48] sm:$0xff] }
   0x9   :  { %v72_v19 = vpack.c.bf16 %v35_v18, %v34_v17  ;;  %v73_v22 = vpack.c.bf16 %v37_v21, %v36_v20  ;;  %v38_v23 = vld [vmem:[%s2413_s0 + $0x50] sm:$0xff]  ;;  %v39_v24 = vld [vmem:[%s2413_s0 + $0x58] sm:$0xff]  ;;  %v40_v26 = vld [vmem:[%s2413_s0 + $0x60] sm:$0xff] }
   0xa   :  { %167 = vmatpush.bf16.msra.mxu0 %v1532_v4  ;;  %v74_v25 = vpack.c.bf16 %v39_v24, %v38_v23  ;;  %v41_v27 = vld [vmem:[%s2413_s0 + $0x68] sm:$0xff]  ;;  %v1546_v29 = vld [vmem:[%s2417_s4 + $0x38] sm:$0xff]  ;;  %v1545_v30 = vld [vmem:[%s2417_s4 + $0x30] sm:$0xff] }
   0xb   :  { %576 = vmatpush.bf16.msra.mxu1 %v1536_v5  ;;  %v75_v28 = vpack.c.bf16 %v41_v27, %v40_v26  ;;  %775 = vmatpush.bf16.msra.mxu2 %v1546_v29  ;;  %v42_v31 = vld [vmem:[%s2413_s0 + $0x70] sm:$0xff]  ;;  %v43_v32 = vld [vmem:[%s2413_s0 + $0x78] sm:$0xff]  ;;  %v1544_v33 = vld [vmem:[%s2417_s4 + $0x28] sm:$0xff] }
   0xc   :  { %v76_v34 = vpack.c.bf16 %v43_v32, %v42_v31  ;;  %v1543_v35 = vld [vmem:[%s2417_s4 + $0x20] sm:$0xff]  ;;  %v1542_v36 = vld [vmem:[%s2417_s4 + $0x18] sm:$0xff]  ;;  %v1541_v37 = vld [vmem:[%s2417_s4 + $0x10] sm:$0xff] }
   0xd   :  { %v44_v38 = vld [vmem:[%s2413_s0 + $0x80] sm:$0xff]  ;;  %v45_v39 = vld [vmem:[%s2413_s0 + $0x88] sm:$0xff]  ;;  %v46_v56 = vld [vmem:[%s2413_s0 + $0x90] sm:$0xff] }
   0xe   :  { %168 = vmatpush.bf16.msra.mxu0 %v1531_v6  ;;  %v1874_v40 = vld [vmem:[%s2415_s2] ss:$0 sm:$0xff]  ;;  %v1540_v41 = vld [vmem:[%s2417_s4 + $0x8] sm:$0xff]  ;;  %v77_v42 = vpack.c.bf16 %v45_v39, %v44_v38  ;;  %v47_v57 = vld [vmem:[%s2413_s0 + $0x98] sm:$0xff] }
   0xf   :  { %577 = vmatpush.bf16.msra.mxu1 %v1535_v9  ;;  %776 = vmatpush.bf16.msra.mxu2 %v1545_v30  ;;  %v1539_v45 = vld [vmem:[%s2417_s4] sm:$0xff]  ;;  %v78_v60 = vpack.c.bf16 %v47_v57, %v46_v56  ;;  %v49_v17 = vld [vmem:[%s2413_s0 + $0xa8] sm:$0xff] }
  0x11   :  { %1419 = vmatmul.msk.bf16.vlgmr.msra.gmra.mxu0 %vm112_vm0, %v69_v10 }
  0x12   :  { %1451 = vmatmul.msk.bf16.vlgmr.msra.gmra.mxu1 %vm112_vm0, %v69_v10 }
  0x13   :  { %777 = vmatpush.bf16.msra.mxu2 %v1544_v33 }
  0x17   :  { %778 = vmatpush.bf16.msra.mxu2 %v1543_v35 }
  0x1b   :  { %779 = vmatpush.bf16.msra.mxu2 %v1542_v36 }
  0x1f   :  { %780 = vmatpush.bf16.msra.mxu2 %v1541_v37 }
  0x21   :  { %1420 = vmatmul.msk.bf16.gmra.mxu0 %vm112_vm0, %v70_v13 }
  0x22   :  { %1452 = vmatmul.msk.bf16.gmra.mxu1 %vm112_vm0, %v70_v13 }
  0x23   :  { %781 = vmatpush.bf16.msra.mxu2 %v1540_v41 }
  0x27   :  { %782 = vmatpush.bf16.msra.mxu2 %v1539_v45 }
  0x31   :  { %1421 = vmatmul.msk.bf16.gmra.mxu0 %vm112_vm0, %v71_v16 }
  0x32   :  { %1453 = vmatmul.msk.bf16.gmra.mxu1 %vm112_vm0, %v71_v16  ;;  %v48_v16 = vld [vmem:[%s2413_s0 + $0xa0] sm:$0xff] }
  0x41   :  { %1422 = vmatmul.msk.bf16.gmra.mxu0 %vm112_vm0, %v72_v19 }
  0x42   :  { %1454 = vmatmul.msk.bf16.gmra.mxu1 %vm112_vm0, %v72_v19 }
  0x51   :  { %1423 = vmatmul.msk.bf16.gmra.mxu0 %vm112_vm0, %v73_v22 }
  0x52   :  { %1455 = vmatmul.msk.bf16.gmra.mxu1 %vm112_vm0, %v73_v22  ;;  %v79_v22 = vpack.c.bf16 %v49_v17, %v48_v16 }
  0x61   :  { %1424 = vmatmul.msk.bf16.gmra.mxu0 %vm112_vm0, %v74_v25 }
  0x62   :  { %1456 = vmatmul.msk.bf16.gmra.mxu1 %vm112_vm0, %v74_v25 }
  0x71   :  { %1425 = vmatmul.msk.bf16.gmra.mxu0 %vm112_vm0, %v75_v28 }
  0x72   :  { %1457 = vmatmul.msk.bf16.gmra.mxu1 %vm112_vm0, %v75_v28 }
  0x81   :  { %1426 = vmatmul.msk.bf16.gmra.mxu0 %vm112_vm0, %v76_v34 }
  0x82   :  { %1458 = vmatmul.msk.bf16.gmra.mxu1 %vm112_vm0, %v76_v34 }
  0x8e   :  { %v170_v43 = vpop.f32.mrf.mxu0 }
  0x8f   :  { %v171_v44 = vadd.f32 %v1874_v40, %v170_v43  ;;  %v579_v46 = vpop.f32.mrf.mxu1 }
  0x91   :  { %v250_v47 = vmul.f32 %v171_v44, %v171_v44  ;;  %1427 = vmatmul.msk.bf16.gmra.mxu0 %vm112_vm0, %v77_v42 }
  0x92   :  { %1459 = vmatmul.msk.bf16.gmra.mxu1 %vm112_vm0, %v77_v42 }
  0x93   :  { %v282_v48 = vmul.f32 %v250_v47, %v171_v44  ;;  %v50_v47 = vld [vmem:[%s2413_s0 + $0xb0] sm:$0xff] }
  0x95   :  { %v314_v49 = vmul.f32 0.044715, %v282_v48  ;;  %v51_v48 = vld [vmem:[%s2413_s0 + $0xb8] sm:$0xff] }
  0x96   :  { %v172_v50 = vpop.f32.mrf.mxu0 }
  0x97   :  { %v173_v51 = vadd.f32 %v1874_v40, %v172_v50  ;;  %v346_v52 = vadd.f32 %v314_v49, %v171_v44  ;;  %v581_v53 = vpop.f32.mrf.mxu1 }
  0x99   :  { %v251_v54 = vmul.f32 %v173_v51, %v173_v51  ;;  %v378_v55 = vmul.f32 0.7978846, %v346_v52 }
  0x9b   :  { %v283_v58 = vmul.f32 %v251_v54, %v173_v51  ;;  %1560 = vtanh.f32 %v378_v55 }
  0x9d   :  { %v315_v59 = vmul.f32 0.044715, %v283_v58 }
  0x9e   :  { %v175_v61 = vpop.f32.mrf.mxu0 }
  0x9f   :  { %v176_v62 = vadd.f32 %v1874_v40, %v175_v61  ;;  %v347_v63 = vadd.f32 %v315_v59, %v173_v51  ;;  %v1893_v0 = vpop.f32.mrf.mxu1 }
  0xa1   :  { %v1561_v1 = vpop.eup %1560  ;;  %v252_v2 = vmul.f32 %v176_v62, %v176_v62  ;;  %1428 = vmatmul.msk.bf16.gmra.mxu0 %vm112_vm0, %v78_v60  ;;  %v379_v3 = vmul.f32 0.7978846, %v347_v63 }
  0xa2   :  { %1460 = vmatmul.msk.bf16.gmra.mxu1 %vm112_vm0, %v78_v60  ;;  %v442_v5 = vadd.f32 1.0, %v1561_v1 }
  0xa3   :  { %v284_v4 = vmul.f32 %v252_v2, %v176_v62  ;;  %1562 = vtanh.f32 %v379_v3 }
  0xa4   :  { %v474_v10 = vmul.f32 0.5, %v442_v5 }
  0xa5   :  { %v316_v6 = vmul.f32 0.044715, %v284_v4 }
  0xa6   :  { %v177_v7 = vpop.f32.mrf.mxu0  ;;  %v506_v19 = vmul.f32 %v474_v10, %v171_v44 }
  0xa7   :  { %v178_v8 = vadd.f32 %v1874_v40, %v177_v7  ;;  %v348_v9 = vadd.f32 %v316_v6, %v176_v62  ;;  %v586_v11 = vpop.f32.mrf.mxu1 }
  0xa8   :  { %v1907_v27 = vadd.f32 %v579_v46, %v506_v19 }
  0xa9   :  { %v1563_v12 = vpop.eup %1562  ;;  %v253_v13 = vmul.f32 %v178_v8, %v178_v8  ;;  %v380_v14 = vmul.f32 0.7978846, %v348_v9 }
  0xaa   :  { %v443_v15 = vadd.f32 1.0, %v1563_v12 }
  0xab   :  { %v285_v18 = vmul.f32 %v253_v13, %v178_v8  ;;  %1564 = vtanh.f32 %v380_v14  ;;  %v52_v13 = vld [vmem:[%s2413_s0 + $0xc0] sm:$0xff]  ;;  %v53_v14 = vld [vmem:[%s2413_s0 + $0xc8] sm:$0xff] }
  0xac   :  { %v475_v20 = vmul.f32 0.5, %v443_v15  ;;  %v81_v19 = vpack.c.bf16 %v53_v14, %v52_v13  ;;  %v56_v14 = vld [vmem:[%s2413_s0 + $0xe0] sm:$0xff] }
  0xad   :  { %v317_v21 = vmul.f32 0.044715, %v285_v18 }
  0xae   :  { %v507_v23 = vmul.f32 %v475_v20, %v173_v51  ;;  %v180_v24 = vpop.f32.mrf.mxu0 }
  0xaf   :  { %v1905_v25 = vadd.f32 %v1874_v40, %v180_v24  ;;  %v349_v26 = vadd.f32 %v317_v21, %v178_v8  ;;  %v1911_v29 = vpop.f32.mrf.mxu1 }
  0xb0   :  { %v1909_v28 = vadd.f32 %v581_v53, %v507_v23  ;;  %v80_v53 = vpack.c.bf16 %v51_v48, %v50_v47  ;;  %v55_v47 = vld [vmem:[%s2413_s0 + $0xd8] sm:$0xff] }
  0xb1   :  { %v1565_v30 = vpop.eup %1564  ;;  %v254_v31 = vmul.f32 %v1905_v25, %v1905_v25  ;;  %1429 = vmatmul.msk.bf16.gmra.mxu0 %vm112_vm0, %v79_v22  ;;  %v381_v32 = vmul.f32 0.7978846, %v349_v26 }
  0xb2   :  { %v708_v33 = vpack.c.bf16 %v1909_v28, %v1907_v27  ;;  %1461 = vmatmul.msk.bf16.gmra.mxu1 %vm112_vm0, %v79_v22  ;;  %v444_v35 = vadd.f32 1.0, %v1565_v30 }
  0xb3   :  { %v286_v34 = vmul.f32 %v254_v31, %v1905_v25  ;;  %1566 = vtanh.f32 %v381_v32 }
  0xb4   :  { %783 = vmatmul.bf16.vlgmr.msra.gmra.mxu2 %v708_v33  ;;  %v476_v41 = vmul.f32 0.5, %v444_v35 }
  0xb5   :  { %v318_v36 = vmul.f32 0.044715, %v286_v34 }
  0xb6   :  { %v182_v37 = vpop.f32.mrf.mxu0  ;;  %v508_v50 = vmul.f32 %v476_v41, %v176_v62 }
  0xb7   :  { %v183_v38 = vadd.f32 %v1874_v40, %v182_v37  ;;  %v350_v39 = vadd.f32 %v318_v36, %v1905_v25  ;;  %v591_v42 = vpop.f32.mrf.mxu1 }
  0xb8   :  { %v1932_v58 = vadd.f32 %v1893_v0, %v508_v50 }
  0xb9   :  { %v1567_v43 = vpop.eup %1566  ;;  %v255_v44 = vmul.f32 %v183_v38, %v183_v38  ;;  %v382_v45 = vmul.f32 0.7978846, %v350_v39 }
  0xba   :  { %v445_v46 = vadd.f32 1.0, %v1567_v43 }
  0xbb   :  { %v287_v49 = vmul.f32 %v255_v44, %v183_v38  ;;  %1568 = vtanh.f32 %v382_v45 }
  0xbc   :  { %v477_v51 = vmul.f32 0.5, %v445_v46  ;;  %v54_v46 = vld [vmem:[%s2413_s0 + $0xd0] sm:$0xff] }
  0xbd   :  { %v319_v52 = vmul.f32 0.044715, %v287_v49 }
  0xbe   :  { %v509_v54 = vmul.f32 %v477_v51, %v178_v8  ;;  %v185_v55 = vpop.f32.mrf.mxu0 }
  0xbf   :  { %v1929_v56 = vadd.f32 %v1874_v40, %v185_v55  ;;  %v351_v57 = vadd.f32 %v319_v52, %v183_v38  ;;  %v1936_v60 = vpop.f32.mrf.mxu1  ;;  %v82_v52 = vpack.c.bf16 %v55_v47, %v54_v46 }
  0xc0   :  { %v1934_v59 = vadd.f32 %v586_v11, %v509_v54 }
  0xc1   :  { %v1569_v61 = vpop.eup %1568  ;;  %v256_v62 = vmul.f32 %v1929_v56, %v1929_v56  ;;  %1430 = vmatmul.msk.bf16.gmra.mxu0 %vm112_vm0, %v80_v53  ;;  %v383_v63 = vmul.f32 0.7978846, %v351_v57 }
  0xc2   :  { %v709_v1 = vpack.c.bf16 %v1934_v59, %v1932_v58  ;;  %1462 = vmatmul.msk.bf16.gmra.mxu1 %vm112_vm0, %v80_v53  ;;  %v446_v0 = vadd.f32 1.0, %v1569_v61 }
  0xc3   :  { %v288_v2 = vmul.f32 %v256_v62, %v1929_v56  ;;  %1570 = vtanh.f32 %v383_v63 }
  0xc4   :  { %788 = vmatmul.bf16.gmra.mxu2 %v709_v1  ;;  %v478_v7 = vmul.f32 0.5, %v446_v0 }
  0xc5   :  { %v320_v3 = vmul.f32 0.044715, %v288_v2 }
  0xc6   :  { %v187_v4 = vpop.f32.mrf.mxu0  ;;  %v510_v16 = vmul.f32 %v478_v7, %v1905_v25 }
  0xc7   :  { %v188_v5 = vadd.f32 %v1874_v40, %v187_v4  ;;  %v352_v6 = vadd.f32 %v320_v3, %v1929_v56  ;;  %v596_v8 = vpop.f32.mrf.mxu1 }
  0xc8   :  { %v1958_v24 = vadd.f32 %v1911_v29, %v510_v16 }
  0xc9   :  { %v1571_v9 = vpop.eup %1570  ;;  %v257_v10 = vmul.f32 %v188_v5, %v188_v5  ;;  %v384_v11 = vmul.f32 0.7978846, %v352_v6 }
  0xca   :  { %v447_v12 = vadd.f32 1.0, %v1571_v9 }
  0xcb   :  { %v289_v15 = vmul.f32 %v257_v10, %v188_v5  ;;  %1572 = vtanh.f32 %v384_v11 }
  0xcc   :  { %v479_v17 = vmul.f32 0.5, %v447_v12 }
  0xcd   :  { %v321_v18 = vmul.f32 0.044715, %v289_v15  ;;  %v57_v15 = vld [vmem:[%s2413_s0 + $0xe8] sm:$0xff] }
  0xce   :  { %v511_v20 = vmul.f32 %v479_v17, %v183_v38  ;;  %v190_v21 = vpop.f32.mrf.mxu0 }
  0xcf   :  { %v1955_v22 = vadd.f32 %v1874_v40, %v190_v21  ;;  %v353_v23 = vadd.f32 %v321_v18, %v188_v5  ;;  %v1962_v30 = vpop.f32.mrf.mxu1 }
  0xd0   :  { %v1960_v26 = vadd.f32 %v591_v42, %v511_v20  ;;  %v83_v20 = vpack.c.bf16 %v57_v15, %v56_v14 }
  0xd1   :  { %v1573_v31 = vpop.eup %1572  ;;  %v258_v25 = vmul.f32 %v1955_v22, %v1955_v22  ;;  %1431 = vmatmul.msk.bf16.gmra.mxu0 %vm112_vm0, %v81_v19  ;;  %v385_v32 = vmul.f32 0.7978846, %v353_v23 }
  0xd2   :  { %v710_v33 = vpack.c.bf16 %v1960_v26, %v1958_v24  ;;  %1463 = vmatmul.msk.bf16.gmra.mxu1 %vm112_vm0, %v81_v19  ;;  %v448_v29 = vadd.f32 1.0, %v1573_v31 }
  0xd3   :  { %v290_v34 = vmul.f32 %v258_v25, %v1955_v22  ;;  %1574 = vtanh.f32 %v385_v32 }
  0xd4   :  { %793 = vmatmul.bf16.gmra.mxu2 %v710_v33  ;;  %v480_v39 = vmul.f32 0.5, %v448_v29 }
  0xd5   :  { %v322_v35 = vmul.f32 0.044715, %v290_v34 }
  0xd6   :  { %v192_v36 = vpop.f32.mrf.mxu0  ;;  %v512_v49 = vmul.f32 %v480_v39, %v1929_v56 }
  0xd7   :  { %v193_v37 = vadd.f32 %v1874_v40, %v192_v36  ;;  %v354_v38 = vadd.f32 %v322_v35, %v1955_v22  ;;  %v601_v41 = vpop.f32.mrf.mxu1 }
  0xd8   :  { %v1984_v61 = vadd.f32 %v1936_v60, %v512_v49  ;;  %v58_v49 = vld [vmem:[%s2413_s0 + $0xf0] sm:$0xff] }
  0xd9   :  { %v1575_v42 = vpop.eup %1574  ;;  %v259_v43 = vmul.f32 %v193_v37, %v193_v37  ;;  %v386_v44 = vmul.f32 0.7978846, %v354_v38 }
  0xda   :  { %v449_v45 = vadd.f32 1.0, %v1575_v42 }
  0xdb   :  { %v291_v48 = vmul.f32 %v259_v43, %v193_v37  ;;  %1576 = vtanh.f32 %v386_v44 }
  0xdc   :  { %v481_v50 = vmul.f32 0.5, %v449_v45 }
  0xdd   :  { %v323_v51 = vmul.f32 0.044715, %v291_v48 }
  0xde   :  { %v513_v53 = vmul.f32 %v481_v50, %v188_v5  ;;  %v195_v54 = vpop.f32.mrf.mxu0  ;;  %v59_v50 = vld [vmem:[%s2413_s0 + $0xf8] sm:$0xff] }
  0xdf   :  { %v1981_v55 = vadd.f32 %v1874_v40, %v195_v54  ;;  %v355_v57 = vadd.f32 %v323_v51, %v193_v37  ;;  %v1988_v63 = vpop.f32.mrf.mxu1 }
  0xe0   :  { %v1986_v62 = vadd.f32 %v596_v8, %v513_v53 }
  0xe1   :  { %v1577_v1 = vpop.eup %1576  ;;  %v260_v56 = vmul.f32 %v1981_v55, %v1981_v55  ;;  %1432 = vmatmul.msk.bf16.gmra.mxu0 %vm112_vm0, %v82_v52  ;;  %v387_v2 = vmul.f32 0.7978846, %v355_v57  ;;  %v84_v57 = vpack.c.bf16 %v59_v50, %v58_v49 }
  0xe2   :  { %v711_v0 = vpack.c.bf16 %v1986_v62, %v1984_v61  ;;  %1464 = vmatmul.msk.bf16.gmra.mxu1 %vm112_vm0, %v82_v52  ;;  %v450_v60 = vadd.f32 1.0, %v1577_v1 }
  0xe3   :  { %v292_v3 = vmul.f32 %v260_v56, %v1981_v55  ;;  %1578 = vtanh.f32 %v387_v2 }
  0xe4   :  { %798 = vmatmul.bf16.gmra.mxu2 %v711_v0  ;;  %v482_v8 = vmul.f32 0.5, %v450_v60 }
  0xe5   :  { %v324_v4 = vmul.f32 0.044715, %v292_v3 }
  0xe6   :  { %v197_v5 = vpop.f32.mrf.mxu0  ;;  %v514_v17 = vmul.f32 %v482_v8, %v1955_v22 }
  0xe7   :  { %v198_v6 = vadd.f32 %v1874_v40, %v197_v5  ;;  %v356_v7 = vadd.f32 %v324_v4, %v1981_v55  ;;  %v606_v9 = vpop.f32.mrf.mxu1 }
  0xe8   :  { %v2008_v32 = vadd.f32 %v1962_v30, %v514_v17 }
  0xe9   :  { %v1579_v10 = vpop.eup %1578  ;;  %v261_v11 = vmul.f32 %v198_v6, %v198_v6  ;;  %v388_v12 = vmul.f32 0.7978846, %v356_v7 }
  0xea   :  { %v451_v13 = vadd.f32 1.0, %v1579_v10 }
  0xeb   :  { %v293_v16 = vmul.f32 %v261_v11, %v198_v6  ;;  %1580 = vtanh.f32 %v388_v12 }
  0xec   :  { %v483_v18 = vmul.f32 0.5, %v451_v13 }
  0xed   :  { %v325_v19 = vmul.f32 0.044715, %v293_v16 }
  0xee   :  { %v515_v21 = vmul.f32 %v483_v18, %v193_v37  ;;  %v200_v23 = vpop.f32.mrf.mxu0 }
  0xef   :  { %v201_v31 = vadd.f32 %v1874_v40, %v200_v23  ;;  %v357_v25 = vadd.f32 %v325_v19, %v198_v6  ;;  %v2012_v34 = vpop.f32.mrf.mxu1 }
  0xf0   :  { %v2010_v33 = vadd.f32 %v601_v41, %v515_v21 }
  0xf1   :  { %v1581_v29 = vpop.eup %1580  ;;  %v262_v35 = vmul.f32 %v201_v31, %v201_v31  ;;  %1433 = vmatmul.msk.bf16.gmra.mxu0 %vm112_vm0, %v83_v20  ;;  %v389_v22 = vmul.f32 0.7978846, %v357_v25 }
  0xf2   :  { %v712_v36 = vpack.c.bf16 %v2010_v33, %v2008_v32  ;;  %1465 = vmatmul.msk.bf16.gmra.mxu1 %vm112_vm0, %v83_v20  ;;  %v452_v38 = vadd.f32 1.0, %v1581_v29 }
  0xf3   :  { %v294_v37 = vmul.f32 %v262_v35, %v201_v31  ;;  %1582 = vtanh.f32 %v389_v22 }
  0xf4   :  { %803 = vmatmul.bf16.gmra.mxu2 %v712_v36  ;;  %v484_v43 = vmul.f32 0.5, %v452_v38 }
  0xf5   :  { %v326_v30 = vmul.f32 0.044715, %v294_v37 }
  0xf6   :  { %v202_v39 = vpop.f32.mrf.mxu0  ;;  %v516_v52 = vmul.f32 %v484_v43, %v1981_v55 }
  0xf7   :  { %v203_v41 = vadd.f32 %v1874_v40, %v202_v39  ;;  %v358_v42 = vadd.f32 %v326_v30, %v201_v31  ;;  %v611_v44 = vpop.f32.mrf.mxu1 }
  0xf8   :  { %v2028_v3 = vadd.f32 %v1988_v63, %v516_v52 }
  0xf9   :  { %v1583_v45 = vpop.eup %1582  ;;  %v263_v46 = vmul.f32 %v203_v41, %v203_v41  ;;  %v390_v47 = vmul.f32 0.7978846, %v358_v42 }
  0xfa   :  { %v453_v48 = vadd.f32 1.0, %v1583_v45 }
  0xfb   :  { %v295_v51 = vmul.f32 %v263_v46, %v203_v41  ;;  %1584 = vtanh.f32 %v390_v47 }
  0xfc   :  { %v485_v53 = vmul.f32 0.5, %v453_v48 }
  0xfd   :  { %v327_v54 = vmul.f32 0.044715, %v295_v51 }
  0xfe   :  { %v517_v1 = vmul.f32 %v485_v53, %v198_v6  ;;  %v205_v56 = vpop.f32.mrf.mxu0 }
  0xff   :  { %v206_v2 = vadd.f32 %v1874_v40, %v205_v56  ;;  %v359_v0 = vadd.f32 %v327_v54, %v203_v41  ;;  %v614_v4 = vpop.f32.mrf.mxu1 }
 0x100   :  { %v2030_v60 = vadd.f32 %v606_v9, %v517_v1  ;;  %v1554_v1 = vld [vmem:[%s2419_s6 + $0x38] sm:$0xff] }
 0x101   :  { %v1585_v5 = vpop.eup %1584  ;;  %v264_v7 = vmul.f32 %v206_v2, %v206_v2  ;;  %1434 = vmatmul.msk.bf16.gmra.mxu0 %vm112_vm0, %v84_v57  ;;  %v391_v8 = vmul.f32 0.7978846, %v359_v0  ;;  %1264 = vmatpush.bf16.msra.mxu3 %v1554_v1 }
 0x102   :  { %v713_v55 = vpack.c.bf16 %v2030_v60, %v2028_v3  ;;  %1466 = vmatmul.msk.bf16.gmra.mxu1 %vm112_vm0, %v84_v57  ;;  %v454_v6 = vadd.f32 1.0, %v1585_v5 }
 0x103   :  { %v296_v10 = vmul.f32 %v264_v7, %v206_v2  ;;  %1586 = vtanh.f32 %v391_v8 }
 0x104   :  { %808 = vmatmul.bf16.gmra.mxu2 %v713_v55  ;;  %v486_v13 = vmul.f32 0.5, %v454_v6 }
 0x105   :  { %v328_v11 = vmul.f32 0.044715, %v296_v10 }
 0x106   :  { %v207_v63 = vpop.f32.mrf.mxu0  ;;  %v518_v20 = vmul.f32 %v486_v13, %v201_v31 }
 0x107   :  { %v208_v9 = vadd.f32 %v1874_v40, %v207_v63  ;;  %v360_v12 = vadd.f32 %v328_v11, %v206_v2  ;;  %v616_v14 = vpop.f32.mrf.mxu1 }
 0x108   :  { %v2041_v36 = vadd.f32 %v2012_v34, %v518_v20 }
 0x109   :  { %v1587_v15 = vpop.eup %1586  ;;  %v265_v16 = vmul.f32 %v208_v9, %v208_v9  ;;  %v392_v17 = vmul.f32 0.7978846, %v360_v12 }
 0x10a   :  { %v455_v18 = vadd.f32 1.0, %v1587_v15 }
 0x10b   :  { %v297_v19 = vmul.f32 %v265_v16, %v208_v9  ;;  %1588 = vtanh.f32 %v392_v17 }
 0x10c   :  { %v487_v21 = vmul.f32 0.5, %v455_v18 }
 0x10d   :  { %v329_v23 = vmul.f32 0.044715, %v297_v19 }
 0x10e   :  { %v519_v25 = vmul.f32 %v487_v21, %v203_v41  ;;  %v210_v29 = vpop.f32.mrf.mxu0  ;;  %v1551_v21 = vld [vmem:[%s2419_s6 + $0x20] sm:$0xff] }
 0x10f   :  { %v2038_v35 = vadd.f32 %v1874_v40, %v210_v29  ;;  %v361_v22 = vadd.f32 %v329_v23, %v208_v9  ;;  %v2045_v38 = vpop.f32.mrf.mxu1 }
 0x110   :  { %v2043_v37 = vadd.f32 %v611_v44, %v519_v25 }
 0x111   :  { %v1589_v30 = vpop.eup %1588  ;;  %v266_v39 = vmul.f32 %v2038_v35, %v2038_v35  ;;  %v393_v31 = vmul.f32 0.7978846, %v361_v22 }
 0x112   :  { %v714_v41 = vpack.c.bf16 %v2043_v37, %v2041_v36  ;;  %v456_v43 = vadd.f32 1.0, %v1589_v30 }
 0x113   :  { %v298_v42 = vmul.f32 %v266_v39, %v2038_v35  ;;  %1590 = vtanh.f32 %v393_v31 }
 0x114   :  { %813 = vmatmul.bf16.gmra.mxu2 %v714_v41  ;;  %v488_v47 = vmul.f32 0.5, %v456_v43  ;;  %v1550_v41 = vld [vmem:[%s2419_s6 + $0x18] sm:$0xff] }
 0x115   :  { %v330_v45 = vmul.f32 0.044715, %v298_v42 }
 0x116   :  { %v212_v34 = vpop.f32.mrf.mxu0  ;;  %v520_v54 = vmul.f32 %v488_v47, %v206_v2  ;;  %v1553_v2 = vld [vmem:[%s2419_s6 + $0x30] sm:$0xff] }
 0x117   :  { %v213_v44 = vadd.f32 %v1874_v40, %v212_v34  ;;  %v362_v46 = vadd.f32 %v330_v45, %v2038_v35  ;;  %v621_v48 = vpop.f32.mrf.mxu1  ;;  %1265 = vmatpush.bf16.msra.mxu3 %v1553_v2 }
 0x118   :  { %v2060_v55 = vadd.f32 %v614_v4, %v520_v54  ;;  %v2107_v54 = vld [vmem:[%s2418_s5] ss:$0 sm:$0xff] }
 0x119   :  { %v1591_v49 = vpop.eup %1590  ;;  %v267_v50 = vmul.f32 %v213_v44, %v213_v44  ;;  %v394_v51 = vmul.f32 0.7978846, %v362_v46 }
 0x11a   :  { %v457_v52 = vadd.f32 1.0, %v1591_v49 }
 0x11b   :  { %v299_v53 = vmul.f32 %v267_v50, %v213_v44  ;;  %1592 = vtanh.f32 %v394_v51 }
 0x11c   :  { %v489_v57 = vmul.f32 0.5, %v457_v52 }
 0x11d   :  { %v331_v56 = vmul.f32 0.044715, %v299_v53 }
 0x11e   :  { %v521_v0 = vmul.f32 %v489_v57, %v208_v9  ;;  %v215_v5 = vpop.f32.mrf.mxu0  ;;  %v1548_v57 = vld [vmem:[%s2419_s6 + $0x8] sm:$0xff] }
 0x11f   :  { %v2058_v7 = vadd.f32 %v1874_v40, %v215_v5  ;;  %v363_v8 = vadd.f32 %v331_v56, %v213_v44  ;;  %v2064_v6 = vpop.f32.mrf.mxu1 }
 0x120   :  { %v2062_v10 = vadd.f32 %v616_v14, %v521_v0  ;;  %v1552_v14 = vld [vmem:[%s2419_s6 + $0x28] sm:$0xff] }
 0x121   :  { %v1593_v11 = vpop.eup %1592  ;;  %v268_v63 = vmul.f32 %v2058_v7, %v2058_v7  ;;  %v395_v9 = vmul.f32 0.7978846, %v363_v8  ;;  %1266 = vmatpush.bf16.msra.mxu3 %v1552_v14 }
 0x122   :  { %v715_v12 = vpack.c.bf16 %v2062_v10, %v2060_v55  ;;  %v458_v13 = vadd.f32 1.0, %v1593_v11 }
 0x123   :  { %v300_v4 = vmul.f32 %v268_v63, %v2058_v7  ;;  %1594 = vtanh.f32 %v395_v9  ;;  %v1547_v63 = vld [vmem:[%s2419_s6] sm:$0xff] }
 0x124   :  { %818 = vmatmul.bf16.gmra.mxu2 %v715_v12  ;;  %v490_v19 = vmul.f32 0.5, %v458_v13 }
 0x125   :  { %v332_v15 = vmul.f32 0.044715, %v300_v4  ;;  %1267 = vmatpush.bf16.msra.mxu3 %v1551_v21 }
 0x126   :  { %v217_v16 = vpop.f32.mrf.mxu0  ;;  %v522_v39 = vmul.f32 %v490_v19, %v2038_v35  ;;  %v1549_v35 = vld [vmem:[%s2419_s6 + $0x10] sm:$0xff] }
 0x127   :  { %v218_v17 = vadd.f32 %v1874_v40, %v217_v16  ;;  %v364_v18 = vadd.f32 %v332_v15, %v2058_v7  ;;  %v626_v20 = vpop.f32.mrf.mxu1 }
 0x128   :  { %v2090_v47 = vadd.f32 %v2045_v38, %v522_v39 }
 0x129   :  { %v1595_v23 = vpop.eup %1594  ;;  %v269_v25 = vmul.f32 %v218_v17, %v218_v17  ;;  %v396_v29 = vmul.f32 0.7978846, %v364_v18  ;;  %1268 = vmatpush.bf16.msra.mxu3 %v1550_v41 }
 0x12a   :  { %v459_v22 = vadd.f32 1.0, %v1595_v23 }
 0x12b   :  { %v301_v30 = vmul.f32 %v269_v25, %v218_v17  ;;  %1596 = vtanh.f32 %v396_v29 }
 0x12c   :  { %v491_v31 = vmul.f32 0.5, %v459_v22 }
 0x12d   :  { %v333_v42 = vmul.f32 0.044715, %v301_v30  ;;  %1269 = vmatpush.bf16.msra.mxu3 %v1549_v35 }
 0x12e   :  { %v523_v43 = vmul.f32 %v491_v31, %v213_v44  ;;  %v220_v45 = vpop.f32.mrf.mxu0 }
 0x12f   :  { %v2087_v34 = vadd.f32 %v1874_v40, %v220_v45  ;;  %v365_v46 = vadd.f32 %v333_v42, %v218_v17  ;;  %v2099_v52 = vpop.f32.mrf.mxu1 }
 0x130   :  { %v2092_v49 = vadd.f32 %v621_v48, %v523_v43 }
 0x131   :  { %v1597_v50 = vpop.eup %1596  ;;  %v270_v51 = vmul.f32 %v2087_v34, %v2087_v34  ;;  %v397_v44 = vmul.f32 0.7978846, %v365_v46  ;;  %1270 = vmatpush.bf16.msra.mxu3 %v1548_v57 }
 0x132   :  { %v716_v53 = vpack.c.bf16 %v2092_v49, %v2090_v47  ;;  %v460_v48 = vadd.f32 1.0, %v1597_v50 }
 0x133   :  { %v302_v38 = vmul.f32 %v270_v51, %v2087_v34  ;;  %1598 = vtanh.f32 %v397_v44 }
 0x134   :  { %823 = vmatmul.bf16.gmra.mxu2 %v716_v53  ;;  %v492_v2 = vmul.f32 0.5, %v460_v48 }
 0x135   :  { %v334_v1 = vmul.f32 0.044715, %v302_v38  ;;  %1271 = vmatpush.bf16.msra.mxu3 %v1547_v63 }
 0x136   :  { %v222_v56 = vpop.f32.mrf.mxu0  ;;  %v524_v18 = vmul.f32 %v492_v2, %v2058_v7 }
 0x137   :  { %v2113_v0 = vadd.f32 %v1874_v40, %v222_v56  ;;  %v784_v5 = vpop.f32.mrf.mxu2  ;;  %v366_v8 = vadd.f32 %v334_v1, %v2087_v34  ;;  %v631_v16 = vpop.f32.mrf.mxu1 }
 0x138   :  { %v2117_v11 = vadd.f32 %v2107_v54, %v784_v5  ;;  %v2134_v41 = vadd.f32 %v2064_v6, %v524_v18 }
 0x139   :  { %v1599_v9 = vpop.eup %1598  ;;  %v271_v12 = vmul.f32 %v2113_v0, %v2113_v0  ;;  %v398_v4 = vmul.f32 0.7978846, %v366_v8 }
 0x13a   :  { %v461_v13 = vadd.f32 1.0, %v1599_v9  ;;  %v864_v14 = vmul.f32 %v2117_v11, %v2117_v11 }
 0x13b   :  { %v303_v15 = vmul.f32 %v271_v12, %v2113_v0  ;;  %1600 = vtanh.f32 %v398_v4 }
 0x13c   :  { %v493_v19 = vmul.f32 0.5, %v461_v13  ;;  %v896_v21 = vmul.f32 %v864_v14, %v2117_v11 }
 0x13d   :  { %v335_v23 = vmul.f32 0.044715, %v303_v15 }
 0x13e   :  { %v525_v25 = vmul.f32 %v493_v19, %v218_v17  ;;  %v928_v29 = vmul.f32 0.044715, %v896_v21  ;;  %v225_v22 = vpop.f32.mrf.mxu0 }
 0x13f   :  { %v2130_v30 = vadd.f32 %v1874_v40, %v225_v22  ;;  %v786_v39 = vpop.f32.mrf.mxu2  ;;  %v367_v31 = vadd.f32 %v335_v23, %v2113_v0  ;;  %v2150_v38 = vpop.f32.mrf.mxu1 }
 0x140   :  { %v2136_v42 = vadd.f32 %v626_v20, %v525_v25  ;;  %v960_v7 = vadd.f32 %v928_v29, %v2117_v11  ;;  %v2140_v43 = vadd.f32 %v2107_v54, %v786_v39 }
 0x141   :  { %v1601_v45 = vpop.eup %1600  ;;  %v272_v17 = vmul.f32 %v2130_v30, %v2130_v30  ;;  %v399_v46 = vmul.f32 0.7978846, %v367_v31 }
 0x142   :  { %v992_v35 = vmul.f32 0.7978846, %v960_v7  ;;  %v865_v50 = vmul.f32 %v2140_v43, %v2140_v43  ;;  %v717_v6 = vpack.c.bf16 %v2136_v42, %v2134_v41  ;;  %v462_v51 = vadd.f32 1.0, %v1601_v45 }
 0x143   :  { %v304_v20 = vmul.f32 %v272_v17, %v2130_v30  ;;  %1602 = vtanh.f32 %v399_v46 }
 0x144   :  { %1604 = vtanh.f32 %v992_v35  ;;  %v897_v44 = vmul.f32 %v865_v50, %v2140_v43  ;;  %828 = vmatmul.bf16.gmra.mxu2 %v717_v6  ;;  %v494_v8 = vmul.f32 0.5, %v462_v51 }
 0x145   :  { %v336_v53 = vmul.f32 0.044715, %v304_v20 }
 0x146   :  { %v929_v48 = vmul.f32 0.044715, %v897_v44  ;;  %v227_v57 = vpop.f32.mrf.mxu0  ;;  %v526_v21 = vmul.f32 %v494_v8, %v2087_v34 }
 0x147   :  { %v2153_v1 = vadd.f32 %v1874_v40, %v227_v57  ;;  %v789_v56 = vpop.f32.mrf.mxu2  ;;  %v368_v5 = vadd.f32 %v336_v53, %v2130_v30  ;;  %v636_v35 = vpop.f32.mrf.mxu1 }
 0x148   :  { %v961_v2 = vadd.f32 %v929_v48, %v2140_v43  ;;  %v2158_v63 = vadd.f32 %v2107_v54, %v789_v56  ;;  %v2173_v50 = vadd.f32 %v2099_v52, %v526_v21 }
 0x149   :  { %v1603_v9 = vpop.eup %1602  ;;  %v273_v12 = vmul.f32 %v2153_v1, %v2153_v1  ;;  %v400_v4 = vmul.f32 0.7978846, %v368_v5 }
 0x14a   :  { %v1605_v13 = vpop.eup %1604  ;;  %v463_v14 = vadd.f32 1.0, %v1603_v9  ;;  %v866_v15 = vmul.f32 %v2158_v63, %v2158_v63  ;;  %v993_v18 = vmul.f32 0.7978846, %v961_v2 }
 0x14b   :  { %v305_v19 = vmul.f32 %v273_v12, %v2153_v1  ;;  %1606 = vtanh.f32 %v400_v4  ;;  %v1056_v22 = vadd.f32 1.0, %v1605_v13 }
 0x14c   :  { %v495_v23 = vmul.f32 0.5, %v463_v14  ;;  %v898_v25 = vmul.f32 %v866_v15, %v2158_v63  ;;  %1608 = vtanh.f32 %v993_v18 }
 0x14d   :  { %v337_v29 = vmul.f32 0.044715, %v305_v19  ;;  %v1088_v53 = vmul.f32 0.5, %v1056_v22 }
 0x14e   :  { %v527_v39 = vmul.f32 %v495_v23, %v2113_v0  ;;  %v930_v31 = vmul.f32 0.044715, %v898_v25  ;;  %v230_v7 = vpop.f32.mrf.mxu0 }
 0x14f   :  { %v2169_v45 = vadd.f32 %v1874_v40, %v230_v7  ;;  %v791_v17 = vpop.f32.mrf.mxu2  ;;  %v369_v46 = vadd.f32 %v337_v29, %v2153_v1  ;;  %v1120_v4 = vmul.f32 %v1088_v53, %v2117_v11 }
 0x150   :  { %v2175_v34 = vadd.f32 %v631_v16, %v527_v39  ;;  %v962_v6 = vadd.f32 %v930_v31, %v2158_v63  ;;  %v2179_v20 = vadd.f32 %v2107_v54, %v791_v17  ;;  %v2203_v17 = vpop.f32.mrf.mxu1 }
 0x151   :  { %v1607_v0 = vpop.eup %1606  ;;  %v274_v51 = vmul.f32 %v2169_v45, %v2169_v45  ;;  %v401_v44 = vmul.f32 0.7978846, %v369_v46  ;;  %v1152_v39 = vadd.f32 %v1120_v4, %v1907_v27 }
 0x152   :  { %v1609_v48 = vpop.eup %1608  ;;  %v994_v57 = vmul.f32 0.7978846, %v962_v6  ;;  %v867_v56 = vmul.f32 %v2179_v20, %v2179_v20  ;;  %v718_v52 = vpack.c.bf16 %v2175_v34, %v2173_v50  ;;  %v464_v8 = vadd.f32 1.0, %v1607_v0 }
 0x153   :  { %v306_v16 = vmul.f32 %v274_v51, %v2169_v45  ;;  %1610 = vtanh.f32 %v401_v44  ;;  %v1057_v5 = vadd.f32 1.0, %v1609_v48 }
 0x154   :  { %1612 = vtanh.f32 %v994_v57  ;;  %v899_v2 = vmul.f32 %v867_v56, %v2179_v20  ;;  %833 = vmatmul.bf16.gmra.mxu2 %v718_v52  ;;  %v496_v23 = vmul.f32 0.5, %v464_v8 }
 0x155   :  { %v338_v9 = vmul.f32 0.044715, %v306_v16  ;;  %v1089_v12 = vmul.f32 0.5, %v1057_v5 }
 0x156   :  { %v931_v13 = vmul.f32 0.044715, %v899_v2  ;;  %v232_v14 = vpop.f32.mrf.mxu0  ;;  %v528_v53 = vmul.f32 %v496_v23, %v2130_v30 }
 0x157   :  { %v2191_v15 = vadd.f32 %v1874_v40, %v232_v14  ;;  %v794_v18 = vpop.f32.mrf.mxu2  ;;  %v1121_v19 = vmul.f32 %v1089_v12, %v2140_v43  ;;  %v370_v21 = vadd.f32 %v338_v9, %v2169_v45 }
 0x158   :  { %v963_v25 = vadd.f32 %v931_v13, %v2179_v20  ;;  %v2197_v29 = vadd.f32 %v2107_v54, %v794_v18  ;;  %v2216_v9 = vadd.f32 %v2150_v38, %v528_v53 }
 0x159   :  { %v1611_v22 = vpop.eup %1610  ;;  %v275_v11 = vmul.f32 %v2191_v15, %v2191_v15  ;;  %v1153_v31 = vadd.f32 %v1121_v19, %v1909_v28  ;;  %v402_v7 = vmul.f32 0.7978846, %v370_v21 }
 0x15a   :  { %v1613_v43 = vpop.eup %1612  ;;  %v465_v46 = vadd.f32 1.0, %v1611_v22  ;;  %v868_v6 = vmul.f32 %v2197_v29, %v2197_v29  ;;  %v995_v0 = vmul.f32 0.7978846, %v963_v25  ;;  %v641_v25 = vpop.f32.mrf.mxu1 }
 0x15b   :  { %v307_v51 = vmul.f32 %v275_v11, %v2191_v15  ;;  %v1200_v44 = vpack.c.bf16 %v1153_v31, %v1152_v39  ;;  %1614 = vtanh.f32 %v402_v7  ;;  %v1058_v57 = vadd.f32 1.0, %v1613_v43 }
 0x15c   :  { %v497_v48 = vmul.f32 0.5, %v465_v46  ;;  %v900_v27 = vmul.f32 %v868_v6, %v2197_v29  ;;  %1616 = vtanh.f32 %v995_v0 }
 0x15d   :  { %v339_v28 = vmul.f32 0.044715, %v307_v51  ;;  %1272 = vmatmul.bf16.vlgmr.msra.gmra.mxu3 %v1200_v44  ;;  %v1090_v18 = vmul.f32 0.5, %v1058_v57 }
 0x15e   :  { %v529_v56 = vmul.f32 %v497_v48, %v2153_v1  ;;  %v932_v52 = vmul.f32 0.044715, %v900_v27  ;;  %v235_v16 = vpop.f32.mrf.mxu0 }
 0x15f   :  { %v2212_v5 = vadd.f32 %v1874_v40, %v235_v16  ;;  %v796_v8 = vpop.f32.mrf.mxu2  ;;  %v371_v2 = vadd.f32 %v339_v28, %v2191_v15  ;;  %v1122_v43 = vmul.f32 %v1090_v18, %v2158_v63 }
 0x160   :  { %v2218_v30 = vadd.f32 %v636_v35, %v529_v56  ;;  %v964_v12 = vadd.f32 %v932_v52, %v2197_v29  ;;  %v2222_v4 = vadd.f32 %v2107_v54, %v796_v8 }
 0x161   :  { %v1615_v13 = vpop.eup %1614  ;;  %v276_v1 = vmul.f32 %v2212_v5, %v2212_v5  ;;  %v403_v14 = vmul.f32 0.7978846, %v371_v2  ;;  %v1154_v56 = vadd.f32 %v1122_v43, %v1932_v58 }
 0x162   :  { %v1617_v19 = vpop.eup %1616  ;;  %v996_v21 = vmul.f32 0.7978846, %v964_v12  ;;  %v869_v23 = vmul.f32 %v2222_v4, %v2222_v4  ;;  %v719_v38 = vpack.c.bf16 %v2218_v30, %v2216_v9  ;;  %v466_v11 = vadd.f32 1.0, %v1615_v13 }
 0x163   :  { %v308_v35 = vmul.f32 %v276_v1, %v2212_v5  ;;  %1618 = vtanh.f32 %v403_v14  ;;  %v1059_v22 = vadd.f32 1.0, %v1617_v19 }
 0x164   :  { %1620 = vtanh.f32 %v996_v21  ;;  %v901_v39 = vmul.f32 %v869_v23, %v2222_v4  ;;  %838 = vmatmul.bf16.gmra.mxu2 %v719_v38  ;;  %v498_v48 = vmul.f32 0.5, %v466_v11 }
 0x165   :  { %v340_v31 = vmul.f32 0.044715, %v308_v35  ;;  %v1091_v7 = vmul.f32 0.5, %v1059_v22  ;;  %v2257_v35 = vld [vmem:[%s2415_s2] ss:$0 sm:$0xff] }
 0x166   :  { %v933_v46 = vmul.f32 0.044715, %v901_v39  ;;  %v237_v6 = vpop.f32.mrf.mxu0  ;;  %v530_v1 = vmul.f32 %v498_v48, %v2169_v45 }
 0x167   :  { %v2234_v0 = vadd.f32 %v1874_v40, %v237_v6  ;;  %v799_v51 = vpop.f32.mrf.mxu2  ;;  %v1123_v44 = vmul.f32 %v1091_v7, %v2179_v20  ;;  %v372_v53 = vadd.f32 %v340_v31, %v2212_v5 }
 0x168   :  { %v965_v27 = vadd.f32 %v933_v46, %v2222_v4  ;;  %v2240_v28 = vadd.f32 %v2107_v54, %v799_v51  ;;  %v2264_v39 = vadd.f32 %v2203_v17, %v530_v1 }
 0x169   :  { %v1619_v57 = vpop.eup %1618  ;;  %v277_v63 = vmul.f32 %v2234_v0, %v2234_v0  ;;  %v1155_v40 = vadd.f32 %v1123_v44, %v1934_v59  ;;  %v404_v52 = vmul.f32 0.7978846, %v372_v53  ;;  %v2251_v59 = vpop.f32.mrf.mxu1 }
 0x16a   :  { %v1621_v16 = vpop.eup %1620  ;;  %v467_v8 = vadd.f32 1.0, %v1619_v57  ;;  %v870_v20 = vmul.f32 %v2240_v28, %v2240_v28  ;;  %v997_v2 = vmul.f32 0.7978846, %v965_v27 }
 0x16b   :  { %v309_v12 = vmul.f32 %v277_v63, %v2234_v0  ;;  %v1201_v13 = vpack.c.bf16 %v1155_v40, %v1154_v56  ;;  %1622 = vtanh.f32 %v404_v52  ;;  %v1060_v19 = vadd.f32 1.0, %v1621_v16 }
 0x16c   :  { %v499_v14 = vmul.f32 0.5, %v467_v8  ;;  %v902_v18 = vmul.f32 %v870_v20, %v2240_v28  ;;  %1624 = vtanh.f32 %v997_v2 }
 0x16d   :  { %v341_v58 = vmul.f32 0.044715, %v309_v12  ;;  %1277 = vmatmul.bf16.gmra.mxu3 %v1201_v13  ;;  %v1092_v51 = vmul.f32 0.5, %v1060_v19 }
 0x16e   :  { %v531_v21 = vmul.f32 %v499_v14, %v2191_v15  ;;  %v934_v23 = vmul.f32 0.044715, %v902_v18  ;;  %v240_v38 = vpop.f32.mrf.mxu0 }
 0x16f   :  { %v2260_v45 = vadd.f32 %v2257_v35, %v240_v38  ;;  %v801_v22 = vpop.f32.mrf.mxu2  ;;  %v373_v11 = vadd.f32 %v341_v58, %v2234_v0  ;;  %v1124_v52 = vmul.f32 %v1092_v51, %v2197_v29 }
 0x170   :  { %v2266_v31 = vadd.f32 %v641_v25, %v531_v21  ;;  %v966_v15 = vadd.f32 %v934_v23, %v2240_v28  ;;  %v2270_v7 = vadd.f32 %v2107_v54, %v801_v22 }
 0x171   :  { %v1623_v43 = vpop.eup %1622  ;;  %v278_v46 = vmul.f32 %v2260_v45, %v2260_v45  ;;  %v405_v6 = vmul.f32 0.7978846, %v373_v11  ;;  %v646_v2 = vpop.f32.mrf.mxu1  ;;  %v1156_v21 = vadd.f32 %v1124_v52, %v1958_v24 }
 0x172   :  { %v1625_v44 = vpop.eup %1624  ;;  %v720_v53 = vpack.c.bf16 %v2266_v31, %v2264_v39  ;;  %v998_v48 = vmul.f32 0.7978846, %v966_v15  ;;  %v871_v17 = vmul.f32 %v2270_v7, %v2270_v7  ;;  %v468_v57 = vadd.f32 1.0, %v1623_v43 }
 0x173   :  { %v310_v25 = vmul.f32 %v278_v46, %v2260_v45  ;;  %1626 = vtanh.f32 %v405_v6  ;;  %v1061_v27 = vadd.f32 1.0, %v1625_v44 }
 0x174   :  { %1628 = vtanh.f32 %v998_v48  ;;  %v903_v63 = vmul.f32 %v871_v17, %v2270_v7  ;;  %843 = vmatmul.bf16.gmra.mxu2 %v720_v53  ;;  %v500_v14 = vmul.f32 0.5, %v468_v57 }
 0x175   :  { %v342_v56 = vmul.f32 0.044715, %v310_v25  ;;  %v1093_v40 = vmul.f32 0.5, %v1061_v27 }
 0x176   :  { %v935_v16 = vmul.f32 0.044715, %v903_v63  ;;  %v242_v8 = vpop.f32.mrf.mxu0  ;;  %v532_v6 = vmul.f32 %v500_v14, %v2212_v5 }
 0x177   :  { %v2282_v20 = vadd.f32 %v2257_v35, %v242_v8  ;;  %v804_v12 = vpop.f32.mrf.mxu2  ;;  %v1125_v13 = vmul.f32 %v1093_v40, %v2222_v4  ;;  %v374_v1 = vadd.f32 %v342_v56, %v2260_v45 }
 0x178   :  { %v967_v18 = vadd.f32 %v935_v16, %v2270_v7  ;;  %v2288_v58 = vadd.f32 %v2107_v54, %v804_v12  ;;  %v2305_v63 = vadd.f32 %v2251_v59, %v532_v6 }
 0x179   :  { %v1627_v19 = vpop.eup %1626  ;;  %v279_v29 = vmul.f32 %v2282_v20, %v2282_v20  ;;  %v1157_v23 = vadd.f32 %v1125_v13, %v1960_v26  ;;  %v406_v38 = vmul.f32 0.7978846, %v374_v1  ;;  %v649_v16 = vpop.f32.mrf.mxu1 }
 0x17a   :  { %v1629_v22 = vpop.eup %1628  ;;  %v469_v11 = vadd.f32 1.0, %v1627_v19  ;;  %v872_v4 = vmul.f32 %v2288_v58, %v2288_v58  ;;  %v999_v15 = vmul.f32 0.7978846, %v967_v18 }
 0x17b   :  { %v311_v43 = vmul.f32 %v279_v29, %v2282_v20  ;;  %v1202_v46 = vpack.c.bf16 %v1157_v23, %v1156_v21  ;;  %1630 = vtanh.f32 %v406_v38  ;;  %v1062_v26 = vadd.f32 1.0, %v1629_v22 }
 0x17c   :  { %v501_v51 = vmul.f32 0.5, %v469_v11  ;;  %v904_v44 = vmul.f32 %v872_v4, %v2288_v58  ;;  %1632 = vtanh.f32 %v999_v15 }
 0x17d   :  { %v343_v24 = vmul.f32 0.044715, %v311_v43  ;;  %1282 = vmatmul.bf16.gmra.mxu3 %v1202_v46  ;;  %v1094_v12 = vmul.f32 0.5, %v1062_v26 }
 0x17e   :  { %v533_v53 = vmul.f32 %v501_v51, %v2234_v0  ;;  %v936_v48 = vmul.f32 0.044715, %v904_v44  ;;  %v245_v17 = vpop.f32.mrf.mxu0 }
 0x17f   :  { %v2301_v25 = vadd.f32 %v2257_v35, %v245_v17  ;;  %v806_v27 = vpop.f32.mrf.mxu2  ;;  %v375_v57 = vadd.f32 %v343_v24, %v2282_v20  ;;  %v1126_v38 = vmul.f32 %v1094_v12, %v2240_v28 }
 0x180   :  { %v2307_v5 = vadd.f32 %v646_v2, %v533_v53  ;;  %v968_v56 = vadd.f32 %v936_v48, %v2288_v58  ;;  %v2311_v40 = vadd.f32 %v2107_v54, %v806_v27 }
 0x181   :  { %v1631_v52 = vpop.eup %1630  ;;  %v280_v0 = vmul.f32 %v2301_v25, %v2301_v25  ;;  %v407_v8 = vmul.f32 0.7978846, %v375_v57  ;;  %v1158_v26 = vadd.f32 %v1126_v38, %v1984_v61 }
 0x182   :  { %v1633_v13 = vpop.eup %1632  ;;  %v721_v1 = vpack.c.bf16 %v2307_v5, %v2305_v63  ;;  %v1000_v59 = vmul.f32 0.7978846, %v968_v56  ;;  %v873_v2 = vmul.f32 %v2311_v40, %v2311_v40  ;;  %v470_v19 = vadd.f32 1.0, %v1631_v52  ;;  %v651_v56 = vpop.f32.mrf.mxu1 }
 0x183   :  { %v312_v14 = vmul.f32 %v280_v0, %v2301_v25  ;;  %1634 = vtanh.f32 %v407_v8  ;;  %v1063_v18 = vadd.f32 1.0, %v1633_v13 }
 0x184   :  { %1636 = vtanh.f32 %v1000_v59  ;;  %v905_v29 = vmul.f32 %v873_v2, %v2311_v40  ;;  %848 = vmatmul.bf16.gmra.mxu2 %v721_v1  ;;  %v502_v6 = vmul.f32 0.5, %v470_v19 }
 0x185   :  { %v344_v21 = vmul.f32 0.044715, %v312_v14  ;;  %v1095_v23 = vmul.f32 0.5, %v1063_v18 }
 0x186   :  { %v937_v22 = vmul.f32 0.044715, %v905_v29  ;;  %v247_v11 = vpop.f32.mrf.mxu0  ;;  %v534_v0 = vmul.f32 %v502_v6, %v2260_v45 }
 0x187   :  { %v2323_v4 = vadd.f32 %v2257_v35, %v247_v11  ;;  %v809_v15 = vpop.f32.mrf.mxu2  ;;  %v1127_v43 = vmul.f32 %v1095_v23, %v2270_v7  ;;  %v376_v46 = vadd.f32 %v344_v21, %v2301_v25 }
 0x188   :  { %v969_v51 = vadd.f32 %v937_v22, %v2311_v40  ;;  %v2329_v44 = vadd.f32 %v2107_v54, %v809_v15  ;;  %v2342_v14 = vadd.f32 %v649_v16, %v534_v0 }
 0x189   :  { %v1635_v24 = vpop.eup %1634  ;;  %v281_v28 = vmul.f32 %v2323_v4, %v2323_v4  ;;  %v1159_v35 = vadd.f32 %v1127_v43, %v1986_v62  ;;  %v408_v53 = vmul.f32 0.7978846, %v376_v46 }
 0x18a   :  { %v1637_v48 = vpop.eup %1636  ;;  %v1001_v17 = vmul.f32 0.7978846, %v969_v51  ;;  %v471_v7 = vadd.f32 1.0, %v1635_v24  ;;  %v874_v27 = vmul.f32 %v2329_v44, %v2329_v44  ;;  %v654_v46 = vpop.f32.mrf.mxu1 }
 0x18b   :  { %v313_v57 = vmul.f32 %v281_v28, %v2323_v4  ;;  %v1203_v52 = vpack.c.bf16 %v1159_v35, %v1158_v26  ;;  %1638 = vtanh.f32 %v408_v53  ;;  %v1064_v62 = vadd.f32 1.0, %v1637_v48 }
 0x18c   :  { %1640 = vtanh.f32 %v1001_v17  ;;  %v503_v8 = vmul.f32 0.5, %v471_v7  ;;  %v906_v61 = vmul.f32 %v874_v27, %v2329_v44 }
 0x18d   :  { %v345_v12 = vmul.f32 0.044715, %v313_v57  ;;  %1287 = vmatmul.bf16.gmra.mxu3 %v1203_v52  ;;  %v1096_v23 = vmul.f32 0.5, %v1064_v62 }
 0x18e   :  { %v535_v13 = vmul.f32 %v503_v8, %v2282_v20  ;;  %v938_v1 = vmul.f32 0.044715, %v906_v61 }
 0x18f   :  { %v811_v59 = vpop.f32.mrf.mxu2  ;;  %v377_v2 = vadd.f32 %v345_v12, %v2323_v4  ;;  %v1128_v51 = vmul.f32 %v1096_v23, %v2288_v58 }
 0x190   :  { %v2344_v18 = vadd.f32 %v651_v56, %v535_v13  ;;  %v970_v19 = vadd.f32 %v938_v1, %v2329_v44  ;;  %v812_v45 = vadd.f32 %v2107_v54, %v811_v59 }
 0x191   :  { %v1639_v29 = vpop.eup %1638  ;;  %v409_v21 = vmul.f32 0.7978846, %v377_v2  ;;  %v1160_v7 = vadd.f32 %v1128_v51, %v2008_v32 }
 0x192   :  { %v1641_v38 = vpop.eup %1640  ;;  %v722_v22 = vpack.c.bf16 %v2344_v18, %v2342_v14  ;;  %v1002_v20 = vmul.f32 0.7978846, %v970_v19  ;;  %v875_v11 = vmul.f32 %v812_v45, %v812_v45  ;;  %v472_v16 = vadd.f32 1.0, %v1639_v29  ;;  %v656_v1 = vpop.f32.mrf.mxu1 }
 0x193   :  { %1642 = vtanh.f32 %v409_v21  ;;  %v1065_v15 = vadd.f32 1.0, %v1641_v38 }
 0x194   :  { %1644 = vtanh.f32 %v1002_v20  ;;  %v907_v43 = vmul.f32 %v875_v11, %v812_v45  ;;  %853 = vmatmul.bf16.gmra.mxu2 %v722_v22  ;;  %v504_v35 = vmul.f32 0.5, %v472_v16 }
 0x195   :  { %v1097_v6 = vmul.f32 0.5, %v1065_v15 }
 0x196   :  { %v939_v24 = vmul.f32 0.044715, %v907_v43  ;;  %v536_v58 = vmul.f32 %v504_v35, %v2301_v25 }
 0x197   :  { %v814_v28 = vpop.f32.mrf.mxu2  ;;  %v1129_v26 = vmul.f32 %v1097_v6, %v2311_v40 }
 0x198   :  { %v971_v53 = vadd.f32 %v939_v24, %v812_v45  ;;  %v815_v48 = vadd.f32 %v2107_v54, %v814_v28  ;;  %v2357_v32 = vadd.f32 %v654_v46, %v536_v58 }
 0x199   :  { %v1643_v17 = vpop.eup %1642  ;;  %v1161_v27 = vadd.f32 %v1129_v26, %v2010_v33 }
 0x19a   :  { %v1645_v57 = vpop.eup %1644  ;;  %v1003_v56 = vmul.f32 0.7978846, %v971_v53  ;;  %v473_v52 = vadd.f32 1.0, %v1643_v17  ;;  %v876_v0 = vmul.f32 %v815_v48, %v815_v48 }
 0x19b   :  { %v1204_v8 = vpack.c.bf16 %v1161_v27, %v1160_v7  ;;  %v1066_v40 = vadd.f32 1.0, %v1645_v57 }
 0x19c   :  { %1646 = vtanh.f32 %v1003_v56  ;;  %v505_v61 = vmul.f32 0.5, %v473_v52  ;;  %v908_v12 = vmul.f32 %v876_v0, %v815_v48 }
 0x19d   :  { %1292 = vmatmul.bf16.gmra.mxu3 %v1204_v8  ;;  %v1098_v29 = vmul.f32 0.5, %v1066_v40 }
 0x19e   :  { %v537_v62 = vmul.f32 %v505_v61, %v2323_v4  ;;  %v940_v13 = vmul.f32 0.044715, %v908_v12 }
 0x19f   :  { %v816_v59 = vpop.f32.mrf.mxu2  ;;  %v1130_v11 = vmul.f32 %v1098_v29, %v2329_v44 }
 0x1a0   :  { %v2359_v33 = vadd.f32 %v656_v1, %v537_v62  ;;  %v972_v2 = vadd.f32 %v940_v13, %v815_v48  ;;  %v817_v19 = vadd.f32 %v2107_v54, %v816_v59 }
 0x1a1   :  { %v1162_v51 = vadd.f32 %v1130_v11, %v2028_v3 }
 0x1a2   :  { %v1647_v21 = vpop.eup %1646  ;;  %v723_v25 = vpack.c.bf16 %v2359_v33, %v2357_v32  ;;  %v1004_v23 = vmul.f32 0.7978846, %v972_v2  ;;  %v877_v38 = vmul.f32 %v817_v19, %v817_v19 }
 0x1a3   :  { %v1067_v22 = vadd.f32 1.0, %v1647_v21 }
 0x1a4   :  { %1648 = vtanh.f32 %v1004_v23  ;;  %v909_v4 = vmul.f32 %v877_v38, %v817_v19  ;;  %858 = vmatmul.bf16.gmra.mxu2 %v723_v25 }
 0x1a5   :  { %v1099_v20 = vmul.f32 0.5, %v1067_v22 }
 0x1a6   :  { %v941_v15 = vmul.f32 0.044715, %v909_v4 }
 0x1a7   :  { %v819_v16 = vpop.f32.mrf.mxu2  ;;  %v1131_v43 = vmul.f32 %v1099_v20, %v812_v45 }
 0x1a8   :  { %v973_v46 = vadd.f32 %v941_v15, %v817_v19  ;;  %v820_v6 = vadd.f32 %v2107_v54, %v819_v16 }
 0x1a9   :  { %v1163_v24 = vadd.f32 %v1131_v43, %v2030_v60 }
 0x1aa   :  { %v1649_v28 = vpop.eup %1648  ;;  %v1005_v26 = vmul.f32 0.7978846, %v973_v46  ;;  %v878_v35 = vmul.f32 %v820_v6, %v820_v6 }
 0x1ab   :  { %v1205_v53 = vpack.c.bf16 %v1163_v24, %v1162_v51  ;;  %v1068_v7 = vadd.f32 1.0, %v1649_v28 }
 0x1ac   :  { %1650 = vtanh.f32 %v1005_v26  ;;  %v910_v17 = vmul.f32 %v878_v35, %v820_v6 }
 0x1ad   :  { %1297 = vmatmul.bf16.gmra.mxu3 %v1205_v53  ;;  %v1100_v56 = vmul.f32 0.5, %v1068_v7 }
 0x1ae   :  { %v942_v27 = vmul.f32 0.044715, %v910_v17 }
 0x1af   :  { %v821_v44 = vpop.f32.mrf.mxu2  ;;  %v1132_v61 = vmul.f32 %v1100_v56, %v815_v48 }
 0x1b0   :  { %v974_v57 = vadd.f32 %v942_v27, %v820_v6  ;;  %v822_v45 = vadd.f32 %v2107_v54, %v821_v44 }
 0x1b1   :  { %v1164_v59 = vadd.f32 %v1132_v61, %v2041_v36 }
 0x1b2   :  { %v1651_v52 = vpop.eup %1650  ;;  %v1006_v0 = vmul.f32 0.7978846, %v974_v57  ;;  %v879_v8 = vmul.f32 %v822_v45, %v822_v45 }
 0x1b3   :  { %v1069_v3 = vadd.f32 1.0, %v1651_v52 }
 0x1b4   :  { %1652 = vtanh.f32 %v1006_v0  ;;  %v911_v60 = vmul.f32 %v879_v8, %v822_v45 }
 0x1b5   :  { %v1101_v58 = vmul.f32 0.5, %v1069_v3 }
 0x1b6   :  { %v943_v12 = vmul.f32 0.044715, %v911_v60 }
 0x1b7   :  { %v824_v40 = vpop.f32.mrf.mxu2  ;;  %v1133_v62 = vmul.f32 %v1101_v58, %v817_v19 }
 0x1b8   :  { %v975_v13 = vadd.f32 %v943_v12, %v822_v45  ;;  %v825_v1 = vadd.f32 %v2107_v54, %v824_v40 }
 0x1b9   :  { %v1165_v2 = vadd.f32 %v1133_v62, %v2043_v37 }
 0x1ba   :  { %v1653_v29 = vpop.eup %1652  ;;  %v1007_v21 = vmul.f32 0.7978846, %v975_v13  ;;  %v880_v25 = vmul.f32 %v825_v1, %v825_v1 }
 0x1bb   :  { %v1206_v23 = vpack.c.bf16 %v1165_v2, %v1164_v59  ;;  %v1070_v22 = vadd.f32 1.0, %v1653_v29 }
 0x1bc   :  { %1654 = vtanh.f32 %v1007_v21  ;;  %v912_v38 = vmul.f32 %v880_v25, %v825_v1 }
 0x1bd   :  { %1302 = vmatmul.bf16.gmra.mxu3 %v1206_v23  ;;  %v1102_v11 = vmul.f32 0.5, %v1070_v22 }
 0x1be   :  { %v944_v4 = vmul.f32 0.044715, %v912_v38 }
 0x1bf   :  { %v826_v48 = vpop.f32.mrf.mxu2  ;;  %v1134_v51 = vmul.f32 %v1102_v11, %v820_v6 }
 0x1c0   :  { %v976_v20 = vadd.f32 %v944_v4, %v825_v1  ;;  %v827_v19 = vadd.f32 %v2107_v54, %v826_v48 }
 0x1c1   :  { %v1166_v17 = vadd.f32 %v1134_v51, %v2060_v55 }
 0x1c2   :  { %v1655_v15 = vpop.eup %1654  ;;  %v1008_v16 = vmul.f32 0.7978846, %v976_v20  ;;  %v881_v43 = vmul.f32 %v827_v19, %v827_v19 }
 0x1c3   :  { %v1071_v36 = vadd.f32 1.0, %v1655_v15 }
 0x1c4   :  { %1656 = vtanh.f32 %v1008_v16  ;;  %v913_v37 = vmul.f32 %v881_v43, %v827_v19 }
 0x1c5   :  { %v1103_v46 = vmul.f32 0.5, %v1071_v36 }
 0x1c6   :  { %v945_v24 = vmul.f32 0.044715, %v913_v37 }
 0x1c7   :  { %v829_v28 = vpop.f32.mrf.mxu2  ;;  %v1135_v26 = vmul.f32 %v1103_v46, %v822_v45 }
 0x1c8   :  { %v977_v35 = vadd.f32 %v945_v24, %v827_v19  ;;  %v830_v53 = vadd.f32 %v2107_v54, %v829_v28 }
 0x1c9   :  { %v1167_v7 = vadd.f32 %v1135_v26, %v2062_v10 }
 0x1ca   :  { %v1657_v27 = vpop.eup %1656  ;;  %v1009_v44 = vmul.f32 0.7978846, %v977_v35  ;;  %v882_v57 = vmul.f32 %v830_v53, %v830_v53 }
 0x1cb   :  { %v1207_v56 = vpack.c.bf16 %v1167_v7, %v1166_v17  ;;  %v1072_v0 = vadd.f32 1.0, %v1657_v27 }
 0x1cc   :  { %1658 = vtanh.f32 %v1009_v44  ;;  %v914_v52 = vmul.f32 %v882_v57, %v830_v53 }
 0x1cd   :  { %1307 = vmatmul.bf16.gmra.mxu3 %v1207_v56  ;;  %v1104_v60 = vmul.f32 0.5, %v1072_v0 }
 0x1ce   :  { %v946_v8 = vmul.f32 0.044715, %v914_v52 }
 0x1cf   :  { %v831_v6 = vpop.f32.mrf.mxu2  ;;  %v1136_v62 = vmul.f32 %v1104_v60, %v825_v1 }
 0x1d0   :  { %v978_v3 = vadd.f32 %v946_v8, %v830_v53  ;;  %v832_v45 = vadd.f32 %v2107_v54, %v831_v6 }
 0x1d1   :  { %v1168_v25 = vadd.f32 %v1136_v62, %v2090_v47 }
 0x1d2   :  { %v1659_v58 = vpop.eup %1658  ;;  %v1010_v61 = vmul.f32 0.7978846, %v978_v3  ;;  %v883_v12 = vmul.f32 %v832_v45, %v832_v45 }
 0x1d3   :  { %v1073_v55 = vadd.f32 1.0, %v1659_v58 }
 0x1d4   :  { %1660 = vtanh.f32 %v1010_v61  ;;  %v915_v10 = vmul.f32 %v883_v12, %v832_v45 }
 0x1d5   :  { %v1105_v40 = vmul.f32 0.5, %v1073_v55 }
 0x1d6   :  { %v947_v13 = vmul.f32 0.044715, %v915_v10 }
 0x1d7   :  { %v834_v59 = vpop.f32.mrf.mxu2  ;;  %v1137_v2 = vmul.f32 %v1105_v40, %v827_v19 }
 0x1d8   :  { %v979_v29 = vadd.f32 %v947_v13, %v832_v45  ;;  %v835_v21 = vadd.f32 %v2107_v54, %v834_v59 }
 0x1d9   :  { %v1169_v23 = vadd.f32 %v1137_v2, %v2092_v49 }
 0x1da   :  { %v1661_v38 = vpop.eup %1660  ;;  %v1011_v22 = vmul.f32 0.7978846, %v979_v29  ;;  %v884_v4 = vmul.f32 %v835_v21, %v835_v21 }
 0x1db   :  { %v1208_v48 = vpack.c.bf16 %v1169_v23, %v1168_v25  ;;  %v1074_v11 = vadd.f32 1.0, %v1661_v38  ;;  %v2388_v38 = vld [vmem:[%s2418_s5] ss:$0 sm:$0xff]  ;;  %s1716_s5 = smov [#allocation2]  }
 0x1dc   :  { %1662 = vtanh.f32 %v1011_v22  ;;  %v916_v20 = vmul.f32 %v884_v4, %v835_v21  ;;  %s1389_s16 = sshll.u32 %s1716_s5, 4  ;;  %s1390_s16 = int_to_ptr.vmem [resolvable:$true] %s1389_s16 }
 0x1dd   :  { %1312 = vmatmul.bf16.gmra.mxu3 %v1208_v48  ;;  %v1106_v36 = vmul.f32 0.5, %v1074_v11 }
 0x1de   :  { %v948_v15 = vmul.f32 0.044715, %v916_v20 }
 0x1df   :  { %v836_v1 = vpop.f32.mrf.mxu2  ;;  %v1138_v28 = vmul.f32 %v1106_v36, %v830_v53 }
 0x1e0   :  { %v980_v16 = vadd.f32 %v948_v15, %v835_v21  ;;  %v837_v19 = vadd.f32 %v2107_v54, %v836_v1  ;;  %v1273_v43 = vpop.f32.mrf.mxu3 }
 0x1e1   :  { %1353 = vst [vmem:[#allocation2] sm:$0xff] %v1273_v43  ;;  %v1170_v57 = vadd.f32 %v1138_v28, %v2134_v41 }
 0x1e2   :  { %v1663_v37 = vpop.eup %1662  ;;  %v1012_v47 = vmul.f32 0.7978846, %v980_v16  ;;  %v885_v46 = vmul.f32 %v837_v19, %v837_v19 }
 0x1e3   :  { %v1075_v49 = vadd.f32 1.0, %v1663_v37 }
 0x1e4   :  { %1664 = vtanh.f32 %v1012_v47  ;;  %v917_v51 = vmul.f32 %v885_v46, %v837_v19 }
 0x1e5   :  { %v1107_v24 = vmul.f32 0.5, %v1075_v49 }
 0x1e6   :  { %v949_v26 = vmul.f32 0.044715, %v917_v51 }
 0x1e7   :  { %v839_v35 = vpop.f32.mrf.mxu2  ;;  %v1139_v17 = vmul.f32 %v1107_v24, %v832_v45 }
 0x1e8   :  { %v981_v7 = vadd.f32 %v949_v26, %v837_v19  ;;  %v840_v27 = vadd.f32 %v2107_v54, %v839_v35  ;;  %v1275_v44 = vpop.f32.mrf.mxu3 }
 0x1e9   :  { %1354 = vst [vmem:[#allocation2 + $0x8] sm:$0xff] %v1275_v44  ;;  %v1171_v56 = vadd.f32 %v1139_v17, %v2136_v42 }
 0x1ea   :  { %v1665_v52 = vpop.eup %1664  ;;  %v1013_v0 = vmul.f32 0.7978846, %v981_v7  ;;  %v886_v8 = vmul.f32 %v840_v27, %v840_v27 }
 0x1eb   :  { %v1209_v6 = vpack.c.bf16 %v1171_v56, %v1170_v57  ;;  %v1076_v53 = vadd.f32 1.0, %v1665_v52 }
 0x1ec   :  { %1666 = vtanh.f32 %v1013_v0  ;;  %v918_v3 = vmul.f32 %v886_v8, %v840_v27 }
 0x1ed   :  { %1317 = vmatmul.bf16.gmra.mxu3 %v1209_v6  ;;  %v1108_v55 = vmul.f32 0.5, %v1076_v53 }
 0x1ee   :  { %v950_v60 = vmul.f32 0.044715, %v918_v3 }
 0x1ef   :  { %v841_v58 = vpop.f32.mrf.mxu2  ;;  %v1140_v59 = vmul.f32 %v1108_v55, %v835_v21 }
 0x1f0   :  { %v982_v45 = vadd.f32 %v950_v60, %v840_v27  ;;  %v842_v61 = vadd.f32 %v2107_v54, %v841_v58  ;;  %v1278_v12 = vpop.f32.mrf.mxu3 }
 0x1f1   :  { %1355 = vst [vmem:[#allocation2 + $0x10] sm:$0xff] %v1278_v12  ;;  %v1172_v4 = vadd.f32 %v1140_v59, %v2173_v50 }
 0x1f2   :  { %v1667_v10 = vpop.eup %1666  ;;  %v1014_v41 = vmul.f32 0.7978846, %v982_v45  ;;  %v887_v40 = vmul.f32 %v842_v61, %v842_v61 }
 0x1f3   :  { %v1077_v42 = vadd.f32 1.0, %v1667_v10 }
 0x1f4   :  { %1668 = vtanh.f32 %v1014_v41  ;;  %v919_v62 = vmul.f32 %v887_v40, %v842_v61 }
 0x1f5   :  { %v1109_v13 = vmul.f32 0.5, %v1077_v42 }
 0x1f6   :  { %v951_v2 = vmul.f32 0.044715, %v919_v62 }
 0x1f7   :  { %v844_v29 = vpop.f32.mrf.mxu2  ;;  %v1141_v25 = vmul.f32 %v1109_v13, %v837_v19 }
 0x1f8   :  { %v983_v23 = vadd.f32 %v951_v2, %v842_v61  ;;  %v845_v54 = vadd.f32 %v2388_v38, %v844_v29  ;;  %v1280_v22 = vpop.f32.mrf.mxu3 }
 0x1f9   :  { %1356 = vst [vmem:[#allocation2 + $0x18] sm:$0xff] %v1280_v22  ;;  %v1173_v48 = vadd.f32 %v1141_v25, %v2175_v34 }
 0x1fa   :  { %v1669_v20 = vpop.eup %1668  ;;  %v1015_v11 = vmul.f32 0.7978846, %v983_v23  ;;  %v888_v21 = vmul.f32 %v845_v54, %v845_v54 }
 0x1fb   :  { %v1210_v15 = vpack.c.bf16 %v1173_v48, %v1172_v4  ;;  %v1078_v16 = vadd.f32 1.0, %v1669_v20 }
 0x1fc   :  { %1670 = vtanh.f32 %v1015_v11  ;;  %v920_v1 = vmul.f32 %v888_v21, %v845_v54 }
 0x1fd   :  { %1322 = vmatmul.bf16.gmra.mxu3 %v1210_v15  ;;  %v1110_v46 = vmul.f32 0.5, %v1078_v16 }
 0x1fe   :  { %v952_v19 = vmul.f32 0.044715, %v920_v1 }
 0x1ff   :  { %v846_v43 = vpop.f32.mrf.mxu2  ;;  %v1142_v26 = vmul.f32 %v1110_v46, %v840_v27 }
 0x200   :  { %v984_v36 = vadd.f32 %v952_v19, %v845_v54  ;;  %v847_v37 = vadd.f32 %v2388_v38, %v846_v43  ;;  %v1283_v47 = vpop.f32.mrf.mxu3 }
 0x201   :  { %1357 = vst [vmem:[#allocation2 + $0x20] sm:$0xff] %v1283_v47  ;;  %v1174_v52 = vadd.f32 %v1142_v26, %v2216_v9 }
 0x202   :  { %v1671_v49 = vpop.eup %1670  ;;  %v1016_v50 = vmul.f32 0.7978846, %v984_v36  ;;  %v889_v51 = vmul.f32 %v847_v37, %v847_v37 }
 0x203   :  { %v1079_v34 = vadd.f32 1.0, %v1671_v49 }
 0x204   :  { %1672 = vtanh.f32 %v1016_v50  ;;  %v921_v24 = vmul.f32 %v889_v51, %v847_v37 }
 0x205   :  { %v1111_v28 = vmul.f32 0.5, %v1079_v34 }
 0x206   :  { %v953_v35 = vmul.f32 0.044715, %v921_v24 }
 0x207   :  { %v849_v17 = vpop.f32.mrf.mxu2  ;;  %v1143_v7 = vmul.f32 %v1111_v28, %v842_v61 }
 0x208   :  { %v985_v44 = vadd.f32 %v953_v35, %v847_v37  ;;  %v850_v57 = vadd.f32 %v2388_v38, %v849_v17  ;;  %v1285_v56 = vpop.f32.mrf.mxu3 }
 0x209   :  { %1358 = vst [vmem:[#allocation2 + $0x28] sm:$0xff] %v1285_v56  ;;  %v1175_v0 = vadd.f32 %v1143_v7, %v2218_v30 }
 0x20a   :  { %v1673_v8 = vpop.eup %1672  ;;  %v1017_v6 = vmul.f32 0.7978846, %v985_v44  ;;  %v890_v3 = vmul.f32 %v850_v57, %v850_v57 }
 0x20b   :  { %v1211_v53 = vpack.c.bf16 %v1175_v0, %v1174_v52  ;;  %v1080_v27 = vadd.f32 1.0, %v1673_v8 }
 0x20c   :  { %1674 = vtanh.f32 %v1017_v6  ;;  %v922_v60 = vmul.f32 %v890_v3, %v850_v57 }
 0x20d   :  { %1327 = vmatmul.bf16.gmra.mxu3 %v1211_v53  ;;  %v1112_v10 = vmul.f32 0.5, %v1080_v27 }
 0x20e   :  { %v954_v58 = vmul.f32 0.044715, %v922_v60 }
 0x20f   :  { %v851_v45 = vpop.f32.mrf.mxu2  ;;  %v1144_v13 = vmul.f32 %v1112_v10, %v845_v54 }
 0x210   :  { %v986_v61 = vadd.f32 %v954_v58, %v850_v57  ;;  %v852_v12 = vadd.f32 %v2388_v38, %v851_v45  ;;  %v1288_v55 = vpop.f32.mrf.mxu3 }
 0x211   :  { %1359 = vst [vmem:[#allocation2 + $0x30] sm:$0xff] %v1288_v55  ;;  %v1176_v4 = vadd.f32 %v1144_v13, %v2264_v39 }
 0x212   :  { %v1675_v41 = vpop.eup %1674  ;;  %v1018_v9 = vmul.f32 0.7978846, %v986_v61  ;;  %v891_v40 = vmul.f32 %v852_v12, %v852_v12 }
 0x213   :  { %v1081_v30 = vadd.f32 1.0, %v1675_v41 }
 0x214   :  { %1676 = vtanh.f32 %v1018_v9  ;;  %v923_v42 = vmul.f32 %v891_v40, %v852_v12 }
 0x215   :  { %v1113_v62 = vmul.f32 0.5, %v1081_v30 }
 0x216   :  { %v955_v59 = vmul.f32 0.044715, %v923_v42 }
 0x217   :  { %v854_v2 = vpop.f32.mrf.mxu2  ;;  %v1145_v29 = vmul.f32 %v1113_v62, %v847_v37 }
 0x218   :  { %v987_v25 = vadd.f32 %v955_v59, %v852_v12  ;;  %v855_v23 = vadd.f32 %v2388_v38, %v854_v2  ;;  %v1290_v22 = vpop.f32.mrf.mxu3 }
 0x219   :  { %1360 = vst [vmem:[#allocation2 + $0x38] sm:$0xff] %v1290_v22  ;;  %v1177_v48 = vadd.f32 %v1145_v29, %v2266_v31 }
 0x21a   :  { %v1677_v20 = vpop.eup %1676  ;;  %v1019_v11 = vmul.f32 0.7978846, %v987_v25  ;;  %v892_v21 = vmul.f32 %v855_v23, %v855_v23 }
 0x21b   :  { %v1212_v15 = vpack.c.bf16 %v1177_v48, %v1176_v4  ;;  %v1082_v54 = vadd.f32 1.0, %v1677_v20 }
 0x21c   :  { %1678 = vtanh.f32 %v1019_v11  ;;  %v924_v1 = vmul.f32 %v892_v21, %v855_v23 }
 0x21d   :  { %1332 = vmatmul.bf16.gmra.mxu3 %v1212_v15  ;;  %v1114_v47 = vmul.f32 0.5, %v1082_v54 }
 0x21e   :  { %v956_v16 = vmul.f32 0.044715, %v924_v1 }
 0x21f   :  { %v856_v19 = vpop.f32.mrf.mxu2  ;;  %v1146_v34 = vmul.f32 %v1114_v47, %v850_v57 }
 0x220   :  { %v988_v43 = vadd.f32 %v956_v16, %v855_v23  ;;  %v857_v36 = vadd.f32 %v2388_v38, %v856_v19  ;;  %v1293_v37 = vpop.f32.mrf.mxu3 }
 0x221   :  { %1361 = vst [vmem:[#allocation2 + $0x40] sm:$0xff] %v1293_v37  ;;  %v1178_v44 = vadd.f32 %v1146_v34, %v2305_v63 }
 0x222   :  { %v1679_v46 = vpop.eup %1678  ;;  %v1020_v39 = vmul.f32 0.7978846, %v988_v43  ;;  %v893_v49 = vmul.f32 %v857_v36, %v857_v36 }
 0x223   :  { %v1083_v31 = vadd.f32 1.0, %v1679_v46 }
 0x224   :  { %1680 = vtanh.f32 %v1020_v39  ;;  %v925_v50 = vmul.f32 %v893_v49, %v857_v36 }
 0x225   :  { %v1115_v51 = vmul.f32 0.5, %v1083_v31 }
 0x226   :  { %v957_v24 = vmul.f32 0.044715, %v925_v50 }
 0x227   :  { %v859_v28 = vpop.f32.mrf.mxu2  ;;  %v1147_v26 = vmul.f32 %v1115_v51, %v852_v12 }
 0x228   :  { %v989_v35 = vadd.f32 %v957_v24, %v857_v36  ;;  %v860_v17 = vadd.f32 %v2388_v38, %v859_v28  ;;  %v1295_v7 = vpop.f32.mrf.mxu3 }
 0x229   :  { %1362 = vst [vmem:[#allocation2 + $0x48] sm:$0xff] %v1295_v7  ;;  %v1179_v56 = vadd.f32 %v1147_v26, %v2307_v5 }
 0x22a   :  { %v1681_v52 = vpop.eup %1680  ;;  %v1021_v0 = vmul.f32 0.7978846, %v989_v35  ;;  %v894_v8 = vmul.f32 %v860_v17, %v860_v17 }
 0x22b   :  { %v1213_v6 = vpack.c.bf16 %v1179_v56, %v1178_v44  ;;  %v1084_v57 = vadd.f32 1.0, %v1681_v52 }
 0x22c   :  { %1682 = vtanh.f32 %v1021_v0  ;;  %v926_v3 = vmul.f32 %v894_v8, %v860_v17 }
 0x22d   :  { %1337 = vmatmul.bf16.gmra.mxu3 %v1213_v6  ;;  %v1116_v61 = vmul.f32 0.5, %v1084_v57 }
 0x22e   :  { %v958_v53 = vmul.f32 0.044715, %v926_v3 }
 0x22f   :  { %v861_v60 = vpop.f32.mrf.mxu2  ;;  %v1148_v9 = vmul.f32 %v1116_v61, %v855_v23 }
 0x230   :  { %v990_v27 = vadd.f32 %v958_v53, %v860_v17  ;;  %v862_v58 = vadd.f32 %v2388_v38, %v861_v60  ;;  %v1298_v45 = vpop.f32.mrf.mxu3 }
 0x231   :  { %1363 = vst [vmem:[#allocation2 + $0x50] sm:$0xff] %v1298_v45  ;;  %v1180_v13 = vadd.f32 %v1148_v9, %v2342_v14 }
 0x232   :  { %v1683_v12 = vpop.eup %1682  ;;  %v1022_v63 = vmul.f32 0.7978846, %v990_v27  ;;  %v895_v55 = vmul.f32 %v862_v58, %v862_v58 }
 0x233   :  { %v1085_v5 = vadd.f32 1.0, %v1683_v12 }
 0x234   :  { %1684 = vtanh.f32 %v1022_v63  ;;  %v927_v10 = vmul.f32 %v895_v55, %v862_v58 }
 0x235   :  { %v1117_v41 = vmul.f32 0.5, %v1085_v5 }
 0x236   :  { %v959_v40 = vmul.f32 0.044715, %v927_v10 }
 0x237   :  { %v1149_v30 = vmul.f32 %v1117_v41, %v857_v36 }
 0x238   :  { %v991_v42 = vadd.f32 %v959_v40, %v862_v58  ;;  %v1300_v62 = vpop.f32.mrf.mxu3 }
 0x239   :  { %1364 = vst [vmem:[#allocation2 + $0x58] sm:$0xff] %v1300_v62  ;;  %v1181_v38 = vadd.f32 %v1149_v30, %v2344_v18 }
 0x23a   :  { %v1685_v59 = vpop.eup %1684  ;;  %v1023_v2 = vmul.f32 0.7978846, %v991_v42 }
 0x23b   :  { %v1214_v29 = vpack.c.bf16 %v1181_v38, %v1180_v13  ;;  %v1086_v25 = vadd.f32 1.0, %v1685_v59 }
 0x23c   :  { %1686 = vtanh.f32 %v1023_v2 }
 0x23d   :  { %1342 = vmatmul.bf16.gmra.mxu3 %v1214_v29  ;;  %v1118_v4 = vmul.f32 0.5, %v1086_v25 }
 0x23f   :  { %v1150_v11 = vmul.f32 %v1118_v4, %v860_v17 }
 0x240   :  { %v1303_v22 = vpop.f32.mrf.mxu3 }
 0x241   :  { %1365 = vst [vmem:[#allocation2 + $0x60] sm:$0xff] %v1303_v22  ;;  %v1182_v14 = vadd.f32 %v1150_v11, %v2357_v32 }
 0x242   :  { %v1687_v48 = vpop.eup %1686 }
 0x243   :  { %v1087_v23 = vadd.f32 1.0, %v1687_v48 }
 0x245   :  { %v1119_v20 = vmul.f32 0.5, %v1087_v23 }
 0x247   :  { %v1151_v21 = vmul.f32 %v1119_v20, %v862_v58 }
 0x248   :  { %v1305_v15 = vpop.f32.mrf.mxu3 }
 0x249   :  { %1366 = vst [vmem:[#allocation2 + $0x68] sm:$0xff] %v1305_v15  ;;  %v1183_v18 = vadd.f32 %v1151_v21, %v2359_v33 }
 0x24b   :  { %v1215_v1 = vpack.c.bf16 %v1183_v18, %v1182_v14 }
 0x24d   :  { %1347 = vmatmul.bf16.gmra.mxu3 %v1215_v1 }
 0x250   :  { %v1308_v54 = vpop.f32.mrf.mxu3 }
 0x251   :  { %1367 = vst [vmem:[#allocation2 + $0x70] sm:$0xff] %v1308_v54 }
 0x258   :  { %v1310_v16 = vpop.f32.mrf.mxu3 }
 0x259   :  { %1368 = vst [vmem:[#allocation2 + $0x78] sm:$0xff] %v1310_v16 }
 0x260   :  { %v1313_v19 = vpop.f32.mrf.mxu3 }
 0x261   :  { %1369 = vst [vmem:[#allocation2 + $0x80] sm:$0xff] %v1313_v19 }
 0x268   :  { %v1315_v43 = vpop.f32.mrf.mxu3 }
 0x269   :  { %1370 = vst [vmem:[#allocation2 + $0x88] sm:$0xff] %v1315_v43 }
 0x270   :  { %v1318_v36 = vpop.f32.mrf.mxu3 }
 0x271   :  { %1371 = vst [vmem:[#allocation2 + $0x90] sm:$0xff] %v1318_v36 }
 0x278   :  { %v1320_v37 = vpop.f32.mrf.mxu3 }
 0x279   :  { %1372 = vst [vmem:[#allocation2 + $0x98] sm:$0xff] %v1320_v37 }
 0x280   :  { %v1323_v47 = vpop.f32.mrf.mxu3 }
 0x281   :  { %1373 = vst [vmem:[#allocation2 + $0xa0] sm:$0xff] %v1323_v47 }
 0x288   :  { %v1325_v46 = vpop.f32.mrf.mxu3 }
 0x289   :  { %1374 = vst [vmem:[#allocation2 + $0xa8] sm:$0xff] %v1325_v46 }
 0x290   :  { %v1328_v32 = vpop.f32.mrf.mxu3 }
 0x291   :  { %1375 = vst [vmem:[#allocation2 + $0xb0] sm:$0xff] %v1328_v32 }
 0x298   :  { %v1330_v33 = vpop.f32.mrf.mxu3 }
 0x299   :  { %1376 = vst [vmem:[#allocation2 + $0xb8] sm:$0xff] %v1330_v33 }
 0x2a0   :  { %v1333_v39 = vpop.f32.mrf.mxu3 }
 0x2a1   :  { %1377 = vst [vmem:[#allocation2 + $0xc0] sm:$0xff] %v1333_v39 }
 0x2a8   :  { %v1335_v49 = vpop.f32.mrf.mxu3 }
 0x2a9   :  { %1378 = vst [vmem:[#allocation2 + $0xc8] sm:$0xff] %v1335_v49 }
 0x2b0   :  { %v1338_v31 = vpop.f32.mrf.mxu3 }
 0x2b1   :  { %1379 = vst [vmem:[#allocation2 + $0xd0] sm:$0xff] %v1338_v31 }
 0x2b8   :  { %v1340_v50 = vpop.f32.mrf.mxu3 }
 0x2b9   :  { %1380 = vst [vmem:[#allocation2 + $0xd8] sm:$0xff] %v1340_v50 }
 0x2c0   :  { %v1343_v51 = vpop.f32.mrf.mxu3 }
 0x2c1   :  { %1381 = vst [vmem:[#allocation2 + $0xe0] sm:$0xff] %v1343_v51 }
 0x2c8   :  { %v1345_v34 = vpop.f32.mrf.mxu3 }
 0x2c9   :  { %1382 = vst [vmem:[#allocation2 + $0xe8] sm:$0xff] %v1345_v34 }
 0x2d0   :  { %v1348_v24 = vpop.f32.mrf.mxu3 }
 0x2d1   :  { %1383 = vst [vmem:[#allocation2 + $0xf0] sm:$0xff] %v1348_v24 }
 0x2d8   :  { %v1350_v28 = vpop.f32.mrf.mxu3 }
 0x2d9   :  { %1384 = vst [vmem:[#allocation2 + $0xf8] sm:$0xff] %v1350_v28 }
 0x2da   :  { %1397 = dma.vmem_to_hbm [thread:$0]  %s1390_s16, 4096, %s1392_s19, [#allocation3], %s1717_s20, %s1717_s20, %s1718_s1  }
 0x2db   :  { %1714 = dma.done.wait [#allocation3], 4096  }
 0x2dc   :  { %1715 = vsyncadd [#allocation3], 4294963200 }
 0x2dd   :  { %1402 = vsyncpa [#allocation3], 1 }

</bundles_post_ra>
